<compile_context>
chip_gen: v7x
topology: tpu7x:2x2x1
jax: 0.10.0
libtpu: 0.0.40
codegen_flags: <defaults>
</compile_context>

<pallas_src>
import functools

import jax
import jax.numpy as jnp
from jax import lax
from jax.experimental import pallas as pl
from jax.experimental.pallas import tpu as pltpu

HIDDEN_DIM = 32
NUM_LAYERS = 2          # hard-wired as two explicitly stacked cells below
INPUT_DIM = 1
OUTPUT_DIM = 1


def lstm_kernel(x_ref, wcomb_ref, slab_ref, out_ref, *, T, B, H, O):
    """One batch group. x_ref: (T*B, 1)  wcomb_ref: (2H, 8H)  slab_ref: (H+4, 4H)."""
    H4 = 4 * H

    # --- unpack the packed weight slab (static row slices are free) -------------------
    wfc = slab_ref[0:H, :]               # (H, 4H), only first O lane-cols nonzero
    wih1 = slab_ref[H:H + 1, :]          # (1, 4H)  layer-1 input weights (input_dim=1)
    b1 = slab_ref[H + 1:H + 2, :]        # (1, 4H)  b_ih_l0 + b_hh_l0 folded
    b2 = slab_ref[H + 2:H + 3, :]        # (1, 4H)  b_ih_l1 + b_hh_l1 folded
    bfc = slab_ref[H + 3:H + 4, :]       # (1, 4H)  fc bias (padded)
    w_comb = wcomb_ref[...]              # (2H, 8H) fused [[whh1, wih2], [0, whh2]]

    # --- hoisted, non-recurrent work ---------------------------------------------------
    # Layer-1 input projection for ALL timesteps: rank-1 -> a single VPU broadcast-mul.
    gates_in1 = x_ref[...] * wih1 + b1                      # (T*B, 4H)
    b2_b = jnp.broadcast_to(b2, (B, H4))                    # broadcast hoisted out of loop

    def cell(gates, c_prev):
        # Two full-vreg EUP ops; 32-lane gate extracts (PyTorch order [i, f, g, o]).
        sig = jax.nn.sigmoid(gates)
        th = jnp.tanh(gates)
        i = sig[:, 0 * H:1 * H]
        f = sig[:, 1 * H:2 * H]
        o = sig[:, 3 * H:4 * H]
        g = th[:, 2 * H:3 * H]
        c_new = f * c_prev + i * g
        return o * jnp.tanh(c_new), c_new

    # --- recurrence: state in vregs, loop fully unrolled (T small & static) -----------
    z = jnp.zeros((B, H), jnp.float32)
    h1, c1, h2, c2 = z, z, z, z
    rec1 = jnp.zeros((B, H4), jnp.float32)                  # h1_{t-1} @ whh1 (init: h1_{-1}=0)

    for t in range(T):
        # Layer 1: its recurrent term was produced by the previous step's fused dot.
        g1 = gates_in1[t * B:(t + 1) * B, :] + rec1
        h1, c1 = cell(g1, c1)

        # Single fused dot: [h1_t @ whh1 | h1_t @ wih2 + h2_{t-1} @ whh2]  -> (B, 8H).
        comb = jnp.dot(jnp.concatenate([h1, h2], axis=1), w_comb,
                       preferred_element_type=jnp.float32)
        rec1 = comb[:, :H4]                                  # layer-1 recurrent, next step
        h2, c2 = cell(comb[:, H4:] + b2_b, c2)               # layer 2

    # fc(out[:, -1, :]) : last layer-2 hidden state through Linear (lane 0..O-1 of slab).
    fc = jnp.dot(h2, wfc, preferred_element_type=jnp.float32) + bfc   # (B, 4H)
    out_ref[...] = fc[:, 0:O].astype(out_ref.dtype)


def lstm_forward(x, params, hidden_dim=HIDDEN_DIM, output_dim=OUTPUT_DIM,
                 num_batch_groups=None):
    B, T, D = x.shape
    H = hidden_dim
    assert D == 1, "rank-1 input projection path assumes input_dim == 1"

    # Batch groups: one grid step per group; "parallel" lets v7x shard across both TCs.
    if num_batch_groups is None:
        num_batch_groups = 2 if (B >= 2 and B % 2 == 0) else 1
    G = num_batch_groups
    assert B % G == 0
    Bg = B // G

    # --- wrapper-side layout plumbing (no compute hoisted out of the kernel) ----------
    # Time-major within each group: row t*Bg + b  ==  x[g*Bg + b, t, :].
    x_g = (x.reshape(G, Bg, T, D)
            .transpose(0, 2, 1, 3)
            .reshape(G, T * Bg, D))

    # Fused block RHS for the per-step dot.
    w_comb = jnp.concatenate([
        jnp.concatenate([params["whh1"], params["wih2"]], axis=1),
        jnp.concatenate([jnp.zeros((H, 4 * H), jnp.float32), params["whh2"]], axis=1),
    ], axis=0)                                                        # (2H, 8H)

    # Pack the remaining small weights/biases into one lane-128 slab (one DMA).
    wfc_pad = jnp.pad(params["wfc"], ((0, 0), (0, 4 * H - output_dim)))   # (H, 4H)
    bfc_pad = jnp.pad(params["bfc"], ((0, 0), (0, 4 * H - output_dim)))   # (1, 4H)
    slab = jnp.concatenate(
        [wfc_pad, params["wih1"], params["b1"], params["b2"], bfc_pad], axis=0)  # (H+4, 4H)

    kernel = functools.partial(lstm_kernel, T=T, B=Bg, H=H, O=output_dim)

    out = pl.pallas_call(
        kernel,
        out_shape=jax.ShapeDtypeStruct((G, Bg, output_dim), jnp.float32),
        grid=(G,),
        in_specs=[
            pl.BlockSpec((None, T * Bg, D), lambda g: (g, 0, 0)),     # per-group inputs
            pl.BlockSpec((2 * H, 8 * H), lambda g: (0, 0)),           # W_comb (shared)
            pl.BlockSpec((H + 4, 4 * H), lambda g: (0, 0)),           # packed slab (shared)
        ],
        out_specs=pl.BlockSpec((None, Bg, output_dim), lambda g: (g, 0, 0)),
        compiler_params=pltpu.CompilerParams(dimension_semantics=("parallel",)),
    )(x_g, w_comb, slab)

    return out.reshape(B, output_dim)


def init_params(key, input_dim=INPUT_DIM, hidden_dim=HIDDEN_DIM,
                output_dim=OUTPUT_DIM):
    """Deterministic init mimicking PyTorch's U(-1/sqrt(H), 1/sqrt(H))."""
    H = hidden_dim
    bound = 1.0 / (H ** 0.5)
    ks = jax.random.split(key, 8)

    def u(k_, shape):
        return jax.random.uniform(k_, shape, jnp.float32, -bound, bound)

    return dict(
        wih1=u(ks[0], (input_dim, 4 * H)),   # transposed weight_ih_l0
        whh1=u(ks[1], (H, 4 * H)),           # transposed weight_hh_l0
        b1=u(ks[2], (1, 4 * H)),             # b_ih_l0 + b_hh_l0 folded
        wih2=u(ks[3], (H, 4 * H)),           # transposed weight_ih_l1
        whh2=u(ks[4], (H, 4 * H)),           # transposed weight_hh_l1
        b2=u(ks[5], (1, 4 * H)),             # b_ih_l1 + b_hh_l1 folded
        wfc=u(ks[6], (H, output_dim)),       # transposed fc.weight
        bfc=u(ks[7], (1, output_dim)),       # fc.bias
    )


def lstm_ref(x, params, hidden_dim=HIDDEN_DIM):
    """Pure-JAX reference with identical math (unfused weights) for a sanity check."""
    H = hidden_dim
    B = x.shape[0]

    def cell(x_t, h, c, wih, whh, b):
        gates = x_t @ wih + h @ whh + b
        i = jax.nn.sigmoid(gates[:, :H])
        f = jax.nn.sigmoid(gates[:, H:2 * H])
        g = jnp.tanh(gates[:, 2 * H:3 * H])
        o = jax.nn.sigmoid(gates[:, 3 * H:])
        c = f * c + i * g
        return o * jnp.tanh(c), c

    z = jnp.zeros((B, H), jnp.float32)

    def step(carry, x_t):
        h1, c1, h2, c2 = carry
        h1, c1 = cell(x_t, h1, c1, params["wih1"], params["whh1"], params["b1"])
        h2, c2 = cell(h1, h2, c2, params["wih2"], params["whh2"], params["b2"])
        return (h1, c1, h2, c2), None

    (h1, c1, h2, c2), _ = lax.scan(step, (z, z, z, z), jnp.transpose(x, (1, 0, 2)))
    return h2 @ params["wfc"] + params["bfc"]


if __name__ == "__main__":
    key = jax.random.PRNGKey(0)
    pkey, xkey = jax.random.split(key)
    params = init_params(pkey)

    B, T, D = 2, 8, INPUT_DIM          # batch=2, seq=8, input_dim=1
    x = jax.random.normal(xkey, (B, T, D), jnp.float32)

    out = lstm_forward(x, params)
    out = jax.block_until_ready(out)

    ref = lstm_ref(x, params)
    assert out.shape == (B, OUTPUT_DIM)
    assert bool(jnp.all(jnp.isfinite(out)))
    assert float(jnp.max(jnp.abs(out - ref))) < 1e-3

    print("KERNEL_OK")
</pallas_src>

<mosaic_0001>
module attributes {stable_mosaic.version = 11 : i64} {
  func.func @lstm_kernel(%arg0: i32, %arg1: memref<1x8x1xf32, #tpu.memory_space<vmem>>, %arg2: memref<64x256xf32, #tpu.memory_space<vmem>>, %arg3: memref<36x128xf32, #tpu.memory_space<vmem>>, %arg4: memref<1x1x1xf32, #tpu.memory_space<vmem>>) attributes {dimension_semantics = [#tpu.dimension_semantics<parallel>], iteration_bounds = array<i64: 2>, scalar_prefetch = 0 : i64, scratch_operands = 0 : i64, tpu.core_type = #tpu.core_type<tc>, window_params = [{transform_indices = @transform_0, window_bounds = array<i64: 1, 8, 1>}, {pipeline_mode = #tpu.pipeline_mode<synchronous>, transform_indices = @transform_1, window_bounds = array<i64: 64, 256>}, {pipeline_mode = #tpu.pipeline_mode<synchronous>, transform_indices = @transform_2, window_bounds = array<i64: 36, 128>}, {transform_indices = @transform_3, window_bounds = array<i64: 1, 1, 1>}]} {
    %c0 = arith.constant 0 : index
    %c0_0 = arith.constant 0 : index
    %0 = vector.load %arg3[%c0, %c0_0] : memref<36x128xf32, #tpu.memory_space<vmem>>, vector<32x128xf32>
    %c32 = arith.constant 32 : index
    %c0_1 = arith.constant 0 : index
    %1 = vector.load %arg3[%c32, %c0_1] : memref<36x128xf32, #tpu.memory_space<vmem>>, vector<1x128xf32>
    %c33 = arith.constant 33 : index
    %c0_2 = arith.constant 0 : index
    %2 = vector.load %arg3[%c33, %c0_2] : memref<36x128xf32, #tpu.memory_space<vmem>>, vector<1x128xf32>
    %c34 = arith.constant 34 : index
    %c0_3 = arith.constant 0 : index
    %3 = vector.load %arg3[%c34, %c0_3] : memref<36x128xf32, #tpu.memory_space<vmem>>, vector<1x128xf32>
    %c35 = arith.constant 35 : index
    %c0_4 = arith.constant 0 : index
    %4 = vector.load %arg3[%c35, %c0_4] : memref<36x128xf32, #tpu.memory_space<vmem>>, vector<1x128xf32>
    %c0_5 = arith.constant 0 : index
    %c0_6 = arith.constant 0 : index
    %5 = vector.load %arg2[%c0_5, %c0_6] : memref<64x256xf32, #tpu.memory_space<vmem>>, vector<64x256xf32>
    %c0_7 = arith.constant 0 : index
    %c0_8 = arith.constant 0 : index
    %c0_9 = arith.constant 0 : index
    %6 = vector.load %arg1[%c0_7, %c0_8, %c0_9] : memref<1x8x1xf32, #tpu.memory_space<vmem>>, vector<1x8x1xf32>
    %7 = vector.shape_cast %6 : vector<1x8x1xf32> to vector<8x1xf32>
    %8 = vector.broadcast %7 : vector<8x1xf32> to vector<8x128xf32>
    %9 = vector.broadcast %1 : vector<1x128xf32> to vector<8x128xf32>
    %10 = arith.mulf %8, %9 : vector<8x128xf32>
    %11 = vector.broadcast %2 : vector<1x128xf32> to vector<8x128xf32>
    %12 = arith.addf %10, %11 : vector<8x128xf32>
    %cst = arith.constant 0.000000e+00 : f32
    %13 = vector.broadcast %cst : f32 to vector<1x32xf32>
    %cst_10 = arith.constant 0.000000e+00 : f32
    %14 = vector.broadcast %cst_10 : f32 to vector<1x128xf32>
    %15 = vector.extract_strided_slice %12 {offsets = [0, 0], sizes = [1, 128], strides = [1, 1]} : vector<8x128xf32> to vector<1x128xf32>
    %16 = arith.addf %15, %14 : vector<1x128xf32>
    %17 = arith.negf %16 : vector<1x128xf32>
    %18 = math.exp %17 : vector<1x128xf32>
    %cst_11 = arith.constant 1.000000e+00 : f32
    %19 = vector.broadcast %cst_11 : f32 to vector<1x128xf32>
    %20 = arith.addf %19, %18 : vector<1x128xf32>
    %21 = arith.divf %19, %20 : vector<1x128xf32>
    %22 = math.tanh %16 : vector<1x128xf32>
    %23 = vector.extract_strided_slice %21 {offsets = [0, 0], sizes = [1, 32], strides = [1, 1]} : vector<1x128xf32> to vector<1x32xf32>
    %24 = vector.extract_strided_slice %21 {offsets = [0, 32], sizes = [1, 32], strides = [1, 1]} : vector<1x128xf32> to vector<1x32xf32>
    %25 = vector.extract_strided_slice %21 {offsets = [0, 96], sizes = [1, 32], strides = [1, 1]} : vector<1x128xf32> to vector<1x32xf32>
    %26 = vector.extract_strided_slice %22 {offsets = [0, 64], sizes = [1, 32], strides = [1, 1]} : vector<1x128xf32> to vector<1x32xf32>
    %27 = arith.mulf %24, %13 : vector<1x32xf32>
    %28 = arith.mulf %23, %26 : vector<1x32xf32>
    %29 = arith.addf %27, %28 : vector<1x32xf32>
    %30 = math.tanh %29 : vector<1x32xf32>
    %31 = arith.mulf %25, %30 : vector<1x32xf32>
    %32 = tpu.concatenate %31, %13 in 1 : vector<1x32xf32>, vector<1x32xf32> -> vector<1x64xf32>
    %cst_12 = arith.constant dense<0.000000e+00> : vector<1x256xf32>
    %33 = tpu.matmul %32, %5, %cst_12 {dimension_numbers = #tpu.dot_dimension_numbers<[1], [0], [0], [1], [0, 0, 1, 1], [], []>} : vector<1x64xf32>, vector<64x256xf32>, vector<1x256xf32> -> vector<1x256xf32>
    %34 = vector.extract_strided_slice %33 {offsets = [0, 0], sizes = [1, 128], strides = [1, 1]} : vector<1x256xf32> to vector<1x128xf32>
    %35 = vector.extract_strided_slice %33 {offsets = [0, 128], sizes = [1, 128], strides = [1, 1]} : vector<1x256xf32> to vector<1x128xf32>
    %36 = arith.addf %35, %3 : vector<1x128xf32>
    %37 = arith.negf %36 : vector<1x128xf32>
    %38 = math.exp %37 : vector<1x128xf32>
    %cst_13 = arith.constant 1.000000e+00 : f32
    %39 = vector.broadcast %cst_13 : f32 to vector<1x128xf32>
    %40 = arith.addf %39, %38 : vector<1x128xf32>
    %41 = arith.divf %39, %40 : vector<1x128xf32>
    %42 = math.tanh %36 : vector<1x128xf32>
    %43 = vector.extract_strided_slice %41 {offsets = [0, 0], sizes = [1, 32], strides = [1, 1]} : vector<1x128xf32> to vector<1x32xf32>
    %44 = vector.extract_strided_slice %41 {offsets = [0, 32], sizes = [1, 32], strides = [1, 1]} : vector<1x128xf32> to vector<1x32xf32>
    %45 = vector.extract_strided_slice %41 {offsets = [0, 96], sizes = [1, 32], strides = [1, 1]} : vector<1x128xf32> to vector<1x32xf32>
    %46 = vector.extract_strided_slice %42 {offsets = [0, 64], sizes = [1, 32], strides = [1, 1]} : vector<1x128xf32> to vector<1x32xf32>
    %47 = arith.mulf %44, %13 : vector<1x32xf32>
    %48 = arith.mulf %43, %46 : vector<1x32xf32>
    %49 = arith.addf %47, %48 : vector<1x32xf32>
    %50 = math.tanh %49 : vector<1x32xf32>
    %51 = arith.mulf %45, %50 : vector<1x32xf32>
    %52 = vector.extract_strided_slice %12 {offsets = [1, 0], sizes = [1, 128], strides = [1, 1]} : vector<8x128xf32> to vector<1x128xf32>
    %53 = arith.addf %52, %34 : vector<1x128xf32>
    %54 = arith.negf %53 : vector<1x128xf32>
    %55 = math.exp %54 : vector<1x128xf32>
    %cst_14 = arith.constant 1.000000e+00 : f32
    %56 = vector.broadcast %cst_14 : f32 to vector<1x128xf32>
    %57 = arith.addf %56, %55 : vector<1x128xf32>
    %58 = arith.divf %56, %57 : vector<1x128xf32>
    %59 = math.tanh %53 : vector<1x128xf32>
    %60 = vector.extract_strided_slice %58 {offsets = [0, 0], sizes = [1, 32], strides = [1, 1]} : vector<1x128xf32> to vector<1x32xf32>
    %61 = vector.extract_strided_slice %58 {offsets = [0, 32], sizes = [1, 32], strides = [1, 1]} : vector<1x128xf32> to vector<1x32xf32>
    %62 = vector.extract_strided_slice %58 {offsets = [0, 96], sizes = [1, 32], strides = [1, 1]} : vector<1x128xf32> to vector<1x32xf32>
    %63 = vector.extract_strided_slice %59 {offsets = [0, 64], sizes = [1, 32], strides = [1, 1]} : vector<1x128xf32> to vector<1x32xf32>
    %64 = arith.mulf %61, %29 : vector<1x32xf32>
    %65 = arith.mulf %60, %63 : vector<1x32xf32>
    %66 = arith.addf %64, %65 : vector<1x32xf32>
    %67 = math.tanh %66 : vector<1x32xf32>
    %68 = arith.mulf %62, %67 : vector<1x32xf32>
    %69 = tpu.concatenate %68, %51 in 1 : vector<1x32xf32>, vector<1x32xf32> -> vector<1x64xf32>
    %cst_15 = arith.constant dense<0.000000e+00> : vector<1x256xf32>
    %70 = tpu.matmul %69, %5, %cst_15 {dimension_numbers = #tpu.dot_dimension_numbers<[1], [0], [0], [1], [0, 0, 1, 1], [], []>} : vector<1x64xf32>, vector<64x256xf32>, vector<1x256xf32> -> vector<1x256xf32>
    %71 = vector.extract_strided_slice %70 {offsets = [0, 0], sizes = [1, 128], strides = [1, 1]} : vector<1x256xf32> to vector<1x128xf32>
    %72 = vector.extract_strided_slice %70 {offsets = [0, 128], sizes = [1, 128], strides = [1, 1]} : vector<1x256xf32> to vector<1x128xf32>
    %73 = arith.addf %72, %3 : vector<1x128xf32>
    %74 = arith.negf %73 : vector<1x128xf32>
    %75 = math.exp %74 : vector<1x128xf32>
    %cst_16 = arith.constant 1.000000e+00 : f32
    %76 = vector.broadcast %cst_16 : f32 to vector<1x128xf32>
    %77 = arith.addf %76, %75 : vector<1x128xf32>
    %78 = arith.divf %76, %77 : vector<1x128xf32>
    %79 = math.tanh %73 : vector<1x128xf32>
    %80 = vector.extract_strided_slice %78 {offsets = [0, 0], sizes = [1, 32], strides = [1, 1]} : vector<1x128xf32> to vector<1x32xf32>
    %81 = vector.extract_strided_slice %78 {offsets = [0, 32], sizes = [1, 32], strides = [1, 1]} : vector<1x128xf32> to vector<1x32xf32>
    %82 = vector.extract_strided_slice %78 {offsets = [0, 96], sizes = [1, 32], strides = [1, 1]} : vector<1x128xf32> to vector<1x32xf32>
    %83 = vector.extract_strided_slice %79 {offsets = [0, 64], sizes = [1, 32], strides = [1, 1]} : vector<1x128xf32> to vector<1x32xf32>
    %84 = arith.mulf %81, %49 : vector<1x32xf32>
    %85 = arith.mulf %80, %83 : vector<1x32xf32>
    %86 = arith.addf %84, %85 : vector<1x32xf32>
    %87 = math.tanh %86 : vector<1x32xf32>
    %88 = arith.mulf %82, %87 : vector<1x32xf32>
    %89 = vector.extract_strided_slice %12 {offsets = [2, 0], sizes = [1, 128], strides = [1, 1]} : vector<8x128xf32> to vector<1x128xf32>
    %90 = arith.addf %89, %71 : vector<1x128xf32>
    %91 = arith.negf %90 : vector<1x128xf32>
    %92 = math.exp %91 : vector<1x128xf32>
    %cst_17 = arith.constant 1.000000e+00 : f32
    %93 = vector.broadcast %cst_17 : f32 to vector<1x128xf32>
    %94 = arith.addf %93, %92 : vector<1x128xf32>
    %95 = arith.divf %93, %94 : vector<1x128xf32>
    %96 = math.tanh %90 : vector<1x128xf32>
    %97 = vector.extract_strided_slice %95 {offsets = [0, 0], sizes = [1, 32], strides = [1, 1]} : vector<1x128xf32> to vector<1x32xf32>
    %98 = vector.extract_strided_slice %95 {offsets = [0, 32], sizes = [1, 32], strides = [1, 1]} : vector<1x128xf32> to vector<1x32xf32>
    %99 = vector.extract_strided_slice %95 {offsets = [0, 96], sizes = [1, 32], strides = [1, 1]} : vector<1x128xf32> to vector<1x32xf32>
    %100 = vector.extract_strided_slice %96 {offsets = [0, 64], sizes = [1, 32], strides = [1, 1]} : vector<1x128xf32> to vector<1x32xf32>
    %101 = arith.mulf %98, %66 : vector<1x32xf32>
    %102 = arith.mulf %97, %100 : vector<1x32xf32>
    %103 = arith.addf %101, %102 : vector<1x32xf32>
    %104 = math.tanh %103 : vector<1x32xf32>
    %105 = arith.mulf %99, %104 : vector<1x32xf32>
    %106 = tpu.concatenate %105, %88 in 1 : vector<1x32xf32>, vector<1x32xf32> -> vector<1x64xf32>
    %cst_18 = arith.constant dense<0.000000e+00> : vector<1x256xf32>
    %107 = tpu.matmul %106, %5, %cst_18 {dimension_numbers = #tpu.dot_dimension_numbers<[1], [0], [0], [1], [0, 0, 1, 1], [], []>} : vector<1x64xf32>, vector<64x256xf32>, vector<1x256xf32> -> vector<1x256xf32>
    %108 = vector.extract_strided_slice %107 {offsets = [0, 0], sizes = [1, 128], strides = [1, 1]} : vector<1x256xf32> to vector<1x128xf32>
    %109 = vector.extract_strided_slice %107 {offsets = [0, 128], sizes = [1, 128], strides = [1, 1]} : vector<1x256xf32> to vector<1x128xf32>
    %110 = arith.addf %109, %3 : vector<1x128xf32>
    %111 = arith.negf %110 : vector<1x128xf32>
    %112 = math.exp %111 : vector<1x128xf32>
    %cst_19 = arith.constant 1.000000e+00 : f32
    %113 = vector.broadcast %cst_19 : f32 to vector<1x128xf32>
    %114 = arith.addf %113, %112 : vector<1x128xf32>
    %115 = arith.divf %113, %114 : vector<1x128xf32>
    %116 = math.tanh %110 : vector<1x128xf32>
    %117 = vector.extract_strided_slice %115 {offsets = [0, 0], sizes = [1, 32], strides = [1, 1]} : vector<1x128xf32> to vector<1x32xf32>
    %118 = vector.extract_strided_slice %115 {offsets = [0, 32], sizes = [1, 32], strides = [1, 1]} : vector<1x128xf32> to vector<1x32xf32>
    %119 = vector.extract_strided_slice %115 {offsets = [0, 96], sizes = [1, 32], strides = [1, 1]} : vector<1x128xf32> to vector<1x32xf32>
    %120 = vector.extract_strided_slice %116 {offsets = [0, 64], sizes = [1, 32], strides = [1, 1]} : vector<1x128xf32> to vector<1x32xf32>
    %121 = arith.mulf %118, %86 : vector<1x32xf32>
    %122 = arith.mulf %117, %120 : vector<1x32xf32>
    %123 = arith.addf %121, %122 : vector<1x32xf32>
    %124 = math.tanh %123 : vector<1x32xf32>
    %125 = arith.mulf %119, %124 : vector<1x32xf32>
    %126 = vector.extract_strided_slice %12 {offsets = [3, 0], sizes = [1, 128], strides = [1, 1]} : vector<8x128xf32> to vector<1x128xf32>
    %127 = arith.addf %126, %108 : vector<1x128xf32>
    %128 = arith.negf %127 : vector<1x128xf32>
    %129 = math.exp %128 : vector<1x128xf32>
    %cst_20 = arith.constant 1.000000e+00 : f32
    %130 = vector.broadcast %cst_20 : f32 to vector<1x128xf32>
    %131 = arith.addf %130, %129 : vector<1x128xf32>
    %132 = arith.divf %130, %131 : vector<1x128xf32>
    %133 = math.tanh %127 : vector<1x128xf32>
    %134 = vector.extract_strided_slice %132 {offsets = [0, 0], sizes = [1, 32], strides = [1, 1]} : vector<1x128xf32> to vector<1x32xf32>
    %135 = vector.extract_strided_slice %132 {offsets = [0, 32], sizes = [1, 32], strides = [1, 1]} : vector<1x128xf32> to vector<1x32xf32>
    %136 = vector.extract_strided_slice %132 {offsets = [0, 96], sizes = [1, 32], strides = [1, 1]} : vector<1x128xf32> to vector<1x32xf32>
    %137 = vector.extract_strided_slice %133 {offsets = [0, 64], sizes = [1, 32], strides = [1, 1]} : vector<1x128xf32> to vector<1x32xf32>
    %138 = arith.mulf %135, %103 : vector<1x32xf32>
    %139 = arith.mulf %134, %137 : vector<1x32xf32>
    %140 = arith.addf %138, %139 : vector<1x32xf32>
    %141 = math.tanh %140 : vector<1x32xf32>
    %142 = arith.mulf %136, %141 : vector<1x32xf32>
    %143 = tpu.concatenate %142, %125 in 1 : vector<1x32xf32>, vector<1x32xf32> -> vector<1x64xf32>
    %cst_21 = arith.constant dense<0.000000e+00> : vector<1x256xf32>
    %144 = tpu.matmul %143, %5, %cst_21 {dimension_numbers = #tpu.dot_dimension_numbers<[1], [0], [0], [1], [0, 0, 1, 1], [], []>} : vector<1x64xf32>, vector<64x256xf32>, vector<1x256xf32> -> vector<1x256xf32>
    %145 = vector.extract_strided_slice %144 {offsets = [0, 0], sizes = [1, 128], strides = [1, 1]} : vector<1x256xf32> to vector<1x128xf32>
    %146 = vector.extract_strided_slice %144 {offsets = [0, 128], sizes = [1, 128], strides = [1, 1]} : vector<1x256xf32> to vector<1x128xf32>
    %147 = arith.addf %146, %3 : vector<1x128xf32>
    %148 = arith.negf %147 : vector<1x128xf32>
    %149 = math.exp %148 : vector<1x128xf32>
    %cst_22 = arith.constant 1.000000e+00 : f32
    %150 = vector.broadcast %cst_22 : f32 to vector<1x128xf32>
    %151 = arith.addf %150, %149 : vector<1x128xf32>
    %152 = arith.divf %150, %151 : vector<1x128xf32>
    %153 = math.tanh %147 : vector<1x128xf32>
    %154 = vector.extract_strided_slice %152 {offsets = [0, 0], sizes = [1, 32], strides = [1, 1]} : vector<1x128xf32> to vector<1x32xf32>
    %155 = vector.extract_strided_slice %152 {offsets = [0, 32], sizes = [1, 32], strides = [1, 1]} : vector<1x128xf32> to vector<1x32xf32>
    %156 = vector.extract_strided_slice %152 {offsets = [0, 96], sizes = [1, 32], strides = [1, 1]} : vector<1x128xf32> to vector<1x32xf32>
    %157 = vector.extract_strided_slice %153 {offsets = [0, 64], sizes = [1, 32], strides = [1, 1]} : vector<1x128xf32> to vector<1x32xf32>
    %158 = arith.mulf %155, %123 : vector<1x32xf32>
    %159 = arith.mulf %154, %157 : vector<1x32xf32>
    %160 = arith.addf %158, %159 : vector<1x32xf32>
    %161 = math.tanh %160 : vector<1x32xf32>
    %162 = arith.mulf %156, %161 : vector<1x32xf32>
    %163 = vector.extract_strided_slice %12 {offsets = [4, 0], sizes = [1, 128], strides = [1, 1]} : vector<8x128xf32> to vector<1x128xf32>
    %164 = arith.addf %163, %145 : vector<1x128xf32>
    %165 = arith.negf %164 : vector<1x128xf32>
    %166 = math.exp %165 : vector<1x128xf32>
    %cst_23 = arith.constant 1.000000e+00 : f32
    %167 = vector.broadcast %cst_23 : f32 to vector<1x128xf32>
    %168 = arith.addf %167, %166 : vector<1x128xf32>
    %169 = arith.divf %167, %168 : vector<1x128xf32>
    %170 = math.tanh %164 : vector<1x128xf32>
    %171 = vector.extract_strided_slice %169 {offsets = [0, 0], sizes = [1, 32], strides = [1, 1]} : vector<1x128xf32> to vector<1x32xf32>
    %172 = vector.extract_strided_slice %169 {offsets = [0, 32], sizes = [1, 32], strides = [1, 1]} : vector<1x128xf32> to vector<1x32xf32>
    %173 = vector.extract_strided_slice %169 {offsets = [0, 96], sizes = [1, 32], strides = [1, 1]} : vector<1x128xf32> to vector<1x32xf32>
    %174 = vector.extract_strided_slice %170 {offsets = [0, 64], sizes = [1, 32], strides = [1, 1]} : vector<1x128xf32> to vector<1x32xf32>
    %175 = arith.mulf %172, %140 : vector<1x32xf32>
    %176 = arith.mulf %171, %174 : vector<1x32xf32>
    %177 = arith.addf %175, %176 : vector<1x32xf32>
    %178 = math.tanh %177 : vector<1x32xf32>
    %179 = arith.mulf %173, %178 : vector<1x32xf32>
    %180 = tpu.concatenate %179, %162 in 1 : vector<1x32xf32>, vector<1x32xf32> -> vector<1x64xf32>
    %cst_24 = arith.constant dense<0.000000e+00> : vector<1x256xf32>
    %181 = tpu.matmul %180, %5, %cst_24 {dimension_numbers = #tpu.dot_dimension_numbers<[1], [0], [0], [1], [0, 0, 1, 1], [], []>} : vector<1x64xf32>, vector<64x256xf32>, vector<1x256xf32> -> vector<1x256xf32>
    %182 = vector.extract_strided_slice %181 {offsets = [0, 0], sizes = [1, 128], strides = [1, 1]} : vector<1x256xf32> to vector<1x128xf32>
    %183 = vector.extract_strided_slice %181 {offsets = [0, 128], sizes = [1, 128], strides = [1, 1]} : vector<1x256xf32> to vector<1x128xf32>
    %184 = arith.addf %183, %3 : vector<1x128xf32>
    %185 = arith.negf %184 : vector<1x128xf32>
    %186 = math.exp %185 : vector<1x128xf32>
    %cst_25 = arith.constant 1.000000e+00 : f32
    %187 = vector.broadcast %cst_25 : f32 to vector<1x128xf32>
    %188 = arith.addf %187, %186 : vector<1x128xf32>
    %189 = arith.divf %187, %188 : vector<1x128xf32>
    %190 = math.tanh %184 : vector<1x128xf32>
    %191 = vector.extract_strided_slice %189 {offsets = [0, 0], sizes = [1, 32], strides = [1, 1]} : vector<1x128xf32> to vector<1x32xf32>
    %192 = vector.extract_strided_slice %189 {offsets = [0, 32], sizes = [1, 32], strides = [1, 1]} : vector<1x128xf32> to vector<1x32xf32>
    %193 = vector.extract_strided_slice %189 {offsets = [0, 96], sizes = [1, 32], strides = [1, 1]} : vector<1x128xf32> to vector<1x32xf32>
    %194 = vector.extract_strided_slice %190 {offsets = [0, 64], sizes = [1, 32], strides = [1, 1]} : vector<1x128xf32> to vector<1x32xf32>
    %195 = arith.mulf %192, %160 : vector<1x32xf32>
    %196 = arith.mulf %191, %194 : vector<1x32xf32>
    %197 = arith.addf %195, %196 : vector<1x32xf32>
    %198 = math.tanh %197 : vector<1x32xf32>
    %199 = arith.mulf %193, %198 : vector<1x32xf32>
    %200 = vector.extract_strided_slice %12 {offsets = [5, 0], sizes = [1, 128], strides = [1, 1]} : vector<8x128xf32> to vector<1x128xf32>
    %201 = arith.addf %200, %182 : vector<1x128xf32>
    %202 = arith.negf %201 : vector<1x128xf32>
    %203 = math.exp %202 : vector<1x128xf32>
    %cst_26 = arith.constant 1.000000e+00 : f32
    %204 = vector.broadcast %cst_26 : f32 to vector<1x128xf32>
    %205 = arith.addf %204, %203 : vector<1x128xf32>
    %206 = arith.divf %204, %205 : vector<1x128xf32>
    %207 = math.tanh %201 : vector<1x128xf32>
    %208 = vector.extract_strided_slice %206 {offsets = [0, 0], sizes = [1, 32], strides = [1, 1]} : vector<1x128xf32> to vector<1x32xf32>
    %209 = vector.extract_strided_slice %206 {offsets = [0, 32], sizes = [1, 32], strides = [1, 1]} : vector<1x128xf32> to vector<1x32xf32>
    %210 = vector.extract_strided_slice %206 {offsets = [0, 96], sizes = [1, 32], strides = [1, 1]} : vector<1x128xf32> to vector<1x32xf32>
    %211 = vector.extract_strided_slice %207 {offsets = [0, 64], sizes = [1, 32], strides = [1, 1]} : vector<1x128xf32> to vector<1x32xf32>
    %212 = arith.mulf %209, %177 : vector<1x32xf32>
    %213 = arith.mulf %208, %211 : vector<1x32xf32>
    %214 = arith.addf %212, %213 : vector<1x32xf32>
    %215 = math.tanh %214 : vector<1x32xf32>
    %216 = arith.mulf %210, %215 : vector<1x32xf32>
    %217 = tpu.concatenate %216, %199 in 1 : vector<1x32xf32>, vector<1x32xf32> -> vector<1x64xf32>
    %cst_27 = arith.constant dense<0.000000e+00> : vector<1x256xf32>
    %218 = tpu.matmul %217, %5, %cst_27 {dimension_numbers = #tpu.dot_dimension_numbers<[1], [0], [0], [1], [0, 0, 1, 1], [], []>} : vector<1x64xf32>, vector<64x256xf32>, vector<1x256xf32> -> vector<1x256xf32>
    %219 = vector.extract_strided_slice %218 {offsets = [0, 0], sizes = [1, 128], strides = [1, 1]} : vector<1x256xf32> to vector<1x128xf32>
    %220 = vector.extract_strided_slice %218 {offsets = [0, 128], sizes = [1, 128], strides = [1, 1]} : vector<1x256xf32> to vector<1x128xf32>
    %221 = arith.addf %220, %3 : vector<1x128xf32>
    %222 = arith.negf %221 : vector<1x128xf32>
    %223 = math.exp %222 : vector<1x128xf32>
    %cst_28 = arith.constant 1.000000e+00 : f32
    %224 = vector.broadcast %cst_28 : f32 to vector<1x128xf32>
    %225 = arith.addf %224, %223 : vector<1x128xf32>
    %226 = arith.divf %224, %225 : vector<1x128xf32>
    %227 = math.tanh %221 : vector<1x128xf32>
    %228 = vector.extract_strided_slice %226 {offsets = [0, 0], sizes = [1, 32], strides = [1, 1]} : vector<1x128xf32> to vector<1x32xf32>
    %229 = vector.extract_strided_slice %226 {offsets = [0, 32], sizes = [1, 32], strides = [1, 1]} : vector<1x128xf32> to vector<1x32xf32>
    %230 = vector.extract_strided_slice %226 {offsets = [0, 96], sizes = [1, 32], strides = [1, 1]} : vector<1x128xf32> to vector<1x32xf32>
    %231 = vector.extract_strided_slice %227 {offsets = [0, 64], sizes = [1, 32], strides = [1, 1]} : vector<1x128xf32> to vector<1x32xf32>
    %232 = arith.mulf %229, %197 : vector<1x32xf32>
    %233 = arith.mulf %228, %231 : vector<1x32xf32>
    %234 = arith.addf %232, %233 : vector<1x32xf32>
    %235 = math.tanh %234 : vector<1x32xf32>
    %236 = arith.mulf %230, %235 : vector<1x32xf32>
    %237 = vector.extract_strided_slice %12 {offsets = [6, 0], sizes = [1, 128], strides = [1, 1]} : vector<8x128xf32> to vector<1x128xf32>
    %238 = arith.addf %237, %219 : vector<1x128xf32>
    %239 = arith.negf %238 : vector<1x128xf32>
    %240 = math.exp %239 : vector<1x128xf32>
    %cst_29 = arith.constant 1.000000e+00 : f32
    %241 = vector.broadcast %cst_29 : f32 to vector<1x128xf32>
    %242 = arith.addf %241, %240 : vector<1x128xf32>
    %243 = arith.divf %241, %242 : vector<1x128xf32>
    %244 = math.tanh %238 : vector<1x128xf32>
    %245 = vector.extract_strided_slice %243 {offsets = [0, 0], sizes = [1, 32], strides = [1, 1]} : vector<1x128xf32> to vector<1x32xf32>
    %246 = vector.extract_strided_slice %243 {offsets = [0, 32], sizes = [1, 32], strides = [1, 1]} : vector<1x128xf32> to vector<1x32xf32>
    %247 = vector.extract_strided_slice %243 {offsets = [0, 96], sizes = [1, 32], strides = [1, 1]} : vector<1x128xf32> to vector<1x32xf32>
    %248 = vector.extract_strided_slice %244 {offsets = [0, 64], sizes = [1, 32], strides = [1, 1]} : vector<1x128xf32> to vector<1x32xf32>
    %249 = arith.mulf %246, %214 : vector<1x32xf32>
    %250 = arith.mulf %245, %248 : vector<1x32xf32>
    %251 = arith.addf %249, %250 : vector<1x32xf32>
    %252 = math.tanh %251 : vector<1x32xf32>
    %253 = arith.mulf %247, %252 : vector<1x32xf32>
    %254 = tpu.concatenate %253, %236 in 1 : vector<1x32xf32>, vector<1x32xf32> -> vector<1x64xf32>
    %cst_30 = arith.constant dense<0.000000e+00> : vector<1x256xf32>
    %255 = tpu.matmul %254, %5, %cst_30 {dimension_numbers = #tpu.dot_dimension_numbers<[1], [0], [0], [1], [0, 0, 1, 1], [], []>} : vector<1x64xf32>, vector<64x256xf32>, vector<1x256xf32> -> vector<1x256xf32>
    %256 = vector.extract_strided_slice %255 {offsets = [0, 0], sizes = [1, 128], strides = [1, 1]} : vector<1x256xf32> to vector<1x128xf32>
    %257 = vector.extract_strided_slice %255 {offsets = [0, 128], sizes = [1, 128], strides = [1, 1]} : vector<1x256xf32> to vector<1x128xf32>
    %258 = arith.addf %257, %3 : vector<1x128xf32>
    %259 = arith.negf %258 : vector<1x128xf32>
    %260 = math.exp %259 : vector<1x128xf32>
    %cst_31 = arith.constant 1.000000e+00 : f32
    %261 = vector.broadcast %cst_31 : f32 to vector<1x128xf32>
    %262 = arith.addf %261, %260 : vector<1x128xf32>
    %263 = arith.divf %261, %262 : vector<1x128xf32>
    %264 = math.tanh %258 : vector<1x128xf32>
    %265 = vector.extract_strided_slice %263 {offsets = [0, 0], sizes = [1, 32], strides = [1, 1]} : vector<1x128xf32> to vector<1x32xf32>
    %266 = vector.extract_strided_slice %263 {offsets = [0, 32], sizes = [1, 32], strides = [1, 1]} : vector<1x128xf32> to vector<1x32xf32>
    %267 = vector.extract_strided_slice %263 {offsets = [0, 96], sizes = [1, 32], strides = [1, 1]} : vector<1x128xf32> to vector<1x32xf32>
    %268 = vector.extract_strided_slice %264 {offsets = [0, 64], sizes = [1, 32], strides = [1, 1]} : vector<1x128xf32> to vector<1x32xf32>
    %269 = arith.mulf %266, %234 : vector<1x32xf32>
    %270 = arith.mulf %265, %268 : vector<1x32xf32>
    %271 = arith.addf %269, %270 : vector<1x32xf32>
    %272 = math.tanh %271 : vector<1x32xf32>
    %273 = arith.mulf %267, %272 : vector<1x32xf32>
    %274 = vector.extract_strided_slice %12 {offsets = [7, 0], sizes = [1, 128], strides = [1, 1]} : vector<8x128xf32> to vector<1x128xf32>
    %275 = arith.addf %274, %256 : vector<1x128xf32>
    %276 = arith.negf %275 : vector<1x128xf32>
    %277 = math.exp %276 : vector<1x128xf32>
    %cst_32 = arith.constant 1.000000e+00 : f32
    %278 = vector.broadcast %cst_32 : f32 to vector<1x128xf32>
    %279 = arith.addf %278, %277 : vector<1x128xf32>
    %280 = arith.divf %278, %279 : vector<1x128xf32>
    %281 = math.tanh %275 : vector<1x128xf32>
    %282 = vector.extract_strided_slice %280 {offsets = [0, 0], sizes = [1, 32], strides = [1, 1]} : vector<1x128xf32> to vector<1x32xf32>
    %283 = vector.extract_strided_slice %280 {offsets = [0, 32], sizes = [1, 32], strides = [1, 1]} : vector<1x128xf32> to vector<1x32xf32>
    %284 = vector.extract_strided_slice %280 {offsets = [0, 96], sizes = [1, 32], strides = [1, 1]} : vector<1x128xf32> to vector<1x32xf32>
    %285 = vector.extract_strided_slice %281 {offsets = [0, 64], sizes = [1, 32], strides = [1, 1]} : vector<1x128xf32> to vector<1x32xf32>
    %286 = arith.mulf %283, %251 : vector<1x32xf32>
    %287 = arith.mulf %282, %285 : vector<1x32xf32>
    %288 = arith.addf %286, %287 : vector<1x32xf32>
    %289 = math.tanh %288 : vector<1x32xf32>
    %290 = arith.mulf %284, %289 : vector<1x32xf32>
    %291 = tpu.concatenate %290, %273 in 1 : vector<1x32xf32>, vector<1x32xf32> -> vector<1x64xf32>
    %cst_33 = arith.constant dense<0.000000e+00> : vector<1x256xf32>
    %292 = tpu.matmul %291, %5, %cst_33 {dimension_numbers = #tpu.dot_dimension_numbers<[1], [0], [0], [1], [0, 0, 1, 1], [], []>} : vector<1x64xf32>, vector<64x256xf32>, vector<1x256xf32> -> vector<1x256xf32>
    %293 = vector.extract_strided_slice %292 {offsets = [0, 128], sizes = [1, 128], strides = [1, 1]} : vector<1x256xf32> to vector<1x128xf32>
    %294 = arith.addf %293, %3 : vector<1x128xf32>
    %295 = arith.negf %294 : vector<1x128xf32>
    %296 = math.exp %295 : vector<1x128xf32>
    %cst_34 = arith.constant 1.000000e+00 : f32
    %297 = vector.broadcast %cst_34 : f32 to vector<1x128xf32>
    %298 = arith.addf %297, %296 : vector<1x128xf32>
    %299 = arith.divf %297, %298 : vector<1x128xf32>
    %300 = math.tanh %294 : vector<1x128xf32>
    %301 = vector.extract_strided_slice %299 {offsets = [0, 0], sizes = [1, 32], strides = [1, 1]} : vector<1x128xf32> to vector<1x32xf32>
    %302 = vector.extract_strided_slice %299 {offsets = [0, 32], sizes = [1, 32], strides = [1, 1]} : vector<1x128xf32> to vector<1x32xf32>
    %303 = vector.extract_strided_slice %299 {offsets = [0, 96], sizes = [1, 32], strides = [1, 1]} : vector<1x128xf32> to vector<1x32xf32>
    %304 = vector.extract_strided_slice %300 {offsets = [0, 64], sizes = [1, 32], strides = [1, 1]} : vector<1x128xf32> to vector<1x32xf32>
    %305 = arith.mulf %302, %271 : vector<1x32xf32>
    %306 = arith.mulf %301, %304 : vector<1x32xf32>
    %307 = arith.addf %305, %306 : vector<1x32xf32>
    %308 = math.tanh %307 : vector<1x32xf32>
    %309 = arith.mulf %303, %308 : vector<1x32xf32>
    %cst_35 = arith.constant dense<0.000000e+00> : vector<1x128xf32>
    %310 = tpu.matmul %309, %0, %cst_35 {dimension_numbers = #tpu.dot_dimension_numbers<[1], [0], [0], [1], [0, 0, 1, 1], [], []>} : vector<1x32xf32>, vector<32x128xf32>, vector<1x128xf32> -> vector<1x128xf32>
    %311 = arith.addf %310, %4 : vector<1x128xf32>
    %312 = vector.extract_strided_slice %311 {offsets = [0, 0], sizes = [1, 1], strides = [1, 1]} : vector<1x128xf32> to vector<1x1xf32>
    %c0_36 = arith.constant 0 : index
    %c0_37 = arith.constant 0 : index
    %c0_38 = arith.constant 0 : index
    %313 = vector.load %arg4[%c0_36, %c0_37, %c0_38] : memref<1x1x1xf32, #tpu.memory_space<vmem>>, vector<1x1x1xf32>
    %314 = vector.shape_cast %313 : vector<1x1x1xf32> to vector<1x1xf32>
    %315 = vector.shape_cast %312 : vector<1x1xf32> to vector<1x1x1xf32>
    tpu.vector_store %arg4[%c0_36, %c0_37, %c0_38], %315 {strides = array<i32>} : memref<1x1x1xf32, #tpu.memory_space<vmem>>, vector<1x1x1xf32>,
    return
  }
  func.func @transform_0(%arg0: i32) -> (i32, i32, i32) {
    %c0_i32 = arith.constant 0 : i32
    %c0_i32_0 = arith.constant 0 : i32
    %c0_i32_1 = arith.constant 0 : i32
    return %arg0, %c0_i32, %c0_i32_0 : i32, i32, i32
  }
  func.func @transform_1(%arg0: i32) -> (i32, i32) {
    %c0_i32 = arith.constant 0 : i32
    %c0_i32_0 = arith.constant 0 : i32
    %c0_i32_1 = arith.constant 0 : i32
    return %c0_i32, %c0_i32_0 : i32, i32
  }
  func.func @transform_2(%arg0: i32) -> (i32, i32) {
    %c0_i32 = arith.constant 0 : i32
    %c0_i32_0 = arith.constant 0 : i32
    %c0_i32_1 = arith.constant 0 : i32
    return %c0_i32, %c0_i32_0 : i32, i32
  }
  func.func @transform_3(%arg0: i32) -> (i32, i32, i32) {
    %c0_i32 = arith.constant 0 : i32
    %c0_i32_0 = arith.constant 0 : i32
    %c0_i32_1 = arith.constant 0 : i32
    return %arg0, %c0_i32, %c0_i32_0 : i32, i32, i32
  }
}

</mosaic_0001>

<bundles_post_ra>
// kernel: tpu_custom_call.1
= control target key start
LH: loop header
LB: loop body
LE: loop exit
PB: predicated region body
PF: predicated region fallthrough
CT: control target
= control target key end

     0   :  { %8 = vsyncpa [#allocation3], 0  ;;  %s2250_s0 = inlined_call_operand.vmem [shape: f32[2,8,1], index: 0, kind: input, shape index: {}]   ;;  %s2251_s1 = inlined_call_operand.hbm [shape: f32[64,256], index: 1, kind: input, shape index: {}]   ;;  %s2252_s2 = inlined_call_operand.hbm [shape: f32[36,128], index: 2, kind: input, shape index: {}]   ;;  %s2253_s3 = inlined_call_operand.vmem [shape: f32[2,1,1], index: 3, kind: output, shape index: {}]  }
   0x1   :  { %9 = vsyncpa [#allocation5], 0  ;;  %s1958_s12 = smov 0  }
   0x2 LB: > { %s1926_s13 = smov [#allocation2]   ;;  %s1964_s15 = sadd.s32 4294967295, %s1924_s12   ;;  %s1924_s12 = sphi %s1958_s12, %s15_s12  }
   0x3   : > { %s126_s14 = sshll.u32 %s1926_s13, 4  ;;  %p1499_p0 = scmp.ge.s32.totalorder %s1924_s12, 1  ;;  %s127_s14 = int_to_ptr.vmem [resolvable:$true] %s126_s14 }
   0x4   : > { %p114_p1 = scmp.lt.s32.totalorder %s1924_s12, 3  ;;  %p2254_p3 = scmp.eq.s32.totalorder %s1964_s15, 0 }
   0x5   : > { %s1927_s17 = smov [#allocation4]   ;;  %s1854_s22 = scalar_lea.hbm %s2251_s1, 2048 }
   0x6   : > { %p1968_p2 = pnand %p1499_p0, %p114_p1  ;;  %s139_s18 = sshll.u32 %s1927_s17, 4  ;;  %s1981_s18 = int_to_ptr.vmem [resolvable:$true] %s139_s18 }
   0x7   : > { %p1855_p6 = scmp.ne.s32.totalorder %s2251_s1, %s1854_s22  ;;  %p1861_p10 = scmp.lt.u32.totalorder %s1854_s22, %s2251_s1 }
   0x8   : > { %s2256_s16 = scalar_select %p1968_p2, 1, 0 }
   0x9   : > { %p1694_p4 = pneg %p1968_p2 }
   0xb   : > { %p1977_p5 = pnand %p2254_p3, %p1694_p4 }
   0xd   : > { %p1856_p7 = pneg %p1977_p5 }
   0xf   : > { %p1857_p8 = pnand %p1856_p7, %p1855_p6 }
  0x11   : > { %p1858_p9 = pneg %p1857_p8 }
  0x13   : > { %p1863_p11 = pnand %p1861_p10, %p1858_p9 }
  0x15   : > { %1866 = shalt.err (!%p1863_p11)
}
  0x16   : > { %s1867_s27 = scalar_lea.vmem %s127_s14, 2048  ;;  %p1875_p1 = scmp.lt.s32.totalorder %s127_s14, %s127_s14 }
  0x17   : > { %p1868_p12 = scmp.ne.s32.totalorder %s127_s14, %s1867_s27  ;;  %p1876_p4 = scmp.lt.s32.totalorder %s1867_s27, %s1867_s27 }
  0x19   : > { %p1870_p13 = pnand %p1868_p12, %p1856_p7  ;;  %p1877_p3 = por %p1876_p4, %p1875_p1 }
  0x1b   : > { %p1871_p0 = pneg %p1870_p13 }
  0x1d   : > { %p1878_p2 = pnand %p1877_p3, %p1871_p0 }
  0x1f   : > { %1881 = shalt.err (!%p1878_p2)
}
  0x20   : > { %s1928_s28 = smov 256   ;;  %s1929_s29 = smov 16  }
  0x21   : > { %1697 = dma.hbm_to_vmem [thread:$0]  (!%p1977_p5), %s2251_s1, 2048, %s127_s14, [#allocation3], %s1928_s28, %s1928_s28, %s1929_s29  }
  0x22   : > { %s1882_s7 = scalar_lea.hbm %s2252_s2, 640 }
  0x23   : > { %p1883_p6 = scmp.ne.s32.totalorder %s2252_s2, %s1882_s7  ;;  %p1889_p8 = scmp.lt.u32.totalorder %s1882_s7, %s2252_s2 }
  0x25   : > { %p1885_p2 = pnand %p1883_p6, %p1856_p7 }
  0x27   : > { %p1886_p3 = pneg %p1885_p2 }
  0x29   : > { %p1891_p9 = pnand %p1889_p8, %p1886_p3 }
  0x2b   : > { %1894 = shalt.err (!%p1891_p9)
}
  0x2c   : > { %s1895_s13 = scalar_lea.vmem %s1981_s18, 640  ;;  %p1903_p13 = scmp.lt.s32.totalorder %s1981_s18, %s1981_s18 }
  0x2d   : > { %p1896_p10 = scmp.ne.s32.totalorder %s1981_s18, %s1895_s13  ;;  %p1904_p0 = scmp.lt.s32.totalorder %s1895_s13, %s1895_s13 }
  0x2f   : > { %p1898_p11 = pnand %p1896_p10, %p1856_p7  ;;  %p1905_p1 = por %p1904_p0, %p1903_p13 }
  0x31   : > { %p1899_p12 = pneg %p1898_p11 }
  0x33   : > { %p1906_p4 = pnand %p1905_p1, %p1899_p12 }
  0x35   : > { %1909 = shalt.err (!%p1906_p4)
}
  0x36   : > { %s1930_s14 = smov 128   ;;  %s1931_s17 = smov 8  }
  0x37   : > { %1700 = dma.hbm_to_vmem [thread:$0]  (!%p1977_p5), %s2252_s2, 640, %s1981_s18, [#allocation5], %s1930_s14, %s1930_s14, %s1931_s17  }
  0x38   : > { %p2258_p6 = scmp.ne.s32.totalorder %s2256_s16, 0 }
  0x39   : > { %p2259_p7 = scmp.eq.s32.totalorder (!%p2258_p6), %s1964_s15, 0 }
  0x3a   : > { %162 = sbr.rel (%p2258_p6) target bundleno = 6571 (0x19ab), region = 32 }
  0x41   : > { %1915 = dma.done.wait (%p2259_p7), [#allocation3], 2048   ;;  %p2260_p2 = pmov %p2259_p7 }
  0x43   : > { %1917 = vsyncadd (%p2260_p2), [#allocation3], 4294965248  ;;  %p2261_p3 = pmov %p2260_p2 }
  0x44   : > { %p2262_p8 = pmov %p2260_p2 }
  0x45   : > { %1919 = dma.done.wait (%p2261_p3), [#allocation5], 640  }
  0x46   : > { %1921 = vsyncadd (%p2262_p8), [#allocation5], 4294966656  ;;  %p187_p9 = scmp.lt.s32.totalorder %s1964_s15, 1  ;;  %v1932_v0 = vmov 0   ;;  %v1507_v2 = vld [vmem:[#allocation4 + $0x20] ss:$0 sm:$0xff] }
  0x47   : > { %1725 = vset.pattern.permute.xlu0 %v1932_v0  ;;  %v1508_v4 = vld [vmem:[#allocation4 + $0x21] ss:$0 sm:$0xff]  ;;  %s1933_s23 = smov 64   ;;  %s1934_s24 = smov 32   ;;  %v203_v17 = vld [vmem:[#allocation2 + $0x8] sm:$0xff]  ;;  %v205_v18 = vld [vmem:[#allocation2 + $0x18] sm:$0xff] }
  0x48   : > { %s2264_s15 = smov (!%p187_p9, %s1964_s15), 1  ;;  %v202_v19 = vld [vmem:[#allocation2] sm:$0xff]  ;;  %v2057_v20 = vpack.c.bf16 %v205_v18, %v203_v17  ;;  %v204_v21 = vld [vmem:[#allocation2 + $0x10] sm:$0xff]  ;;  %v207_v22 = vld [vmem:[#allocation2 + $0x28] sm:$0xff]  ;;  %v1935_v42 = vmov 0.0   ;;  %vm263_vm0 = vcmask 261120  }
  0x49   : > { %s1506_s16 = sshll.u32 %s2264_s15, 3  ;;  %v209_v23 = vld [vmem:[#allocation2 + $0x38] sm:$0xff]  ;;  %v2059_v24 = vpack.c.bf16 %v204_v21, %v202_v19  ;;  %v206_v26 = vld [vmem:[#allocation2 + $0x20] sm:$0xff]  ;;  %v208_v27 = vld [vmem:[#allocation2 + $0x30] sm:$0xff]  ;;  %333 = vmatprep.mubr.f32.mxu0 %v1935_v42  ;;  %474 = vmatprep.mubr.f32.mxu1 %v1935_v42  ;;  %vm265_vm1 = vcmask 523264   ;;  %vm1937_vm2 = vmmov 0   ;;  %s193_s27 = scalar_lea.vmem %s2253_s3, %s2264_s15 }
  0x4a   : > { %s190_s22 = scalar_lea.vmem %s2250_s0, %s1506_s16  ;;  %v2061_v25 = vpack.c.bf16 %v209_v23, %v207_v22  ;;  %v211_v28 = vld [vmem:[#allocation2 + $0x48] sm:$0xff]  ;;  %1553 = vmatprep.subr.bf16.mxu0 %v2057_v20  ;;  %v213_v29 = vld [vmem:[#allocation2 + $0x58] sm:$0xff]  ;;  %1569 = vmatprep.subr.bf16.mxu1 %v2057_v20  ;;  %v2066_v30 = vpack.c.bf16 %v208_v27, %v206_v26  ;;  %v210_v32 = vld [vmem:[#allocation2 + $0x40] sm:$0xff]  ;;  %vm1426_vm3 = vcmask 0  }
  0x4b   : > { %v218_v1 = vld [vmem:[%s190_s22] sm:$0xff]  ;;  %1555 = vmatpush1.bf16.msra.mxu0 %v2059_v24  ;;  %1571 = vmatpush1.bf16.msra.mxu1 %v2059_v24  ;;  %v2070_v31 = vpack.c.bf16 %v213_v29, %v211_v28  ;;  %v212_v33 = vld [vmem:[#allocation2 + $0x50] sm:$0xff]  ;;  %v215_v34 = vld [vmem:[#allocation2 + $0x68] sm:$0xff] }
  0x4c   : > { %221 = vperm.xlu0 %1725, %v218_v1   ;;  %1557 = vmatprep.subr.bf16.mxu0 %v2061_v25  ;;  %v217_v35 = vld [vmem:[#allocation2 + $0x78] sm:$0xff]  ;;  %v2074_v36 = vpack.c.bf16 %v212_v33, %v210_v32  ;;  %v214_v38 = vld [vmem:[#allocation2 + $0x60] sm:$0xff]  ;;  %v216_v39 = vld [vmem:[#allocation2 + $0x70] sm:$0xff] }
  0x4d   : > { %1573 = vmatprep.subr.bf16.mxu1 %v2061_v25  ;;  %v2078_v37 = vpack.c.bf16 %v217_v35, %v215_v34  ;;  %v2083_v41 = vpack.c.bf16 %v216_v39, %v214_v38  ;;  %v2106_v47 = vld [vmem:[#allocation4 + $0x22] sm:$0x1] }
  0x4f   : > { %1559 = vmatpush1.bf16.msra.mxu0 %v2066_v30  ;;  %1575 = vmatpush1.bf16.msra.mxu1 %v2066_v30 }
  0x50   : > { %1561 = vmatprep.subr.bf16.mxu0 %v2070_v31  ;;  %1577 = vmatprep.subr.bf16.mxu1 %v2070_v31 }
  0x53   : > { %1563 = vmatpush1.bf16.msra.mxu0 %v2074_v36  ;;  %1579 = vmatpush1.bf16.msra.mxu1 %v2074_v36 }
  0x54   : > { %1565 = vmatprep.subr.bf16.mxu0 %v2078_v37  ;;  %1581 = vmatprep.subr.bf16.mxu1 %v2078_v37 }
  0x57   : > { %1567 = vmatpush1.bf16.msra.mxu0 %v2083_v41  ;;  %1583 = vmatpush1.bf16.msra.mxu1 %v2083_v41 }
  0x58   : > { %1585 = vmatprep.subr.bf16.mxu0 %v2057_v20  ;;  %1601 = vmatprep.subr.bf16.mxu1 %v2057_v20 }
  0xcb   : > { %v222_v3 = vpop.permute.xlu0 %221 }
  0xcc   : > { %v228_v5 = vmul.f32 %v1507_v2, %v222_v3 }
  0xce   : > { %v2048_v6 = vadd.f32 %v1508_v4, %v228_v5 }
  0xd0   : > { %1726 = vtanh.f32 %v2048_v6  ;;  %v1509_v8 = vmul.f32 -1.442695, %v2048_v6 }
  0xd2   : > { %1728 = vpow2.f32 %v1509_v8 }
  0xda   : > { %v1727_v7 = vpop.eup %1726 }
  0xdb   : > { %244 = vrot.lane.b32.xlu0 %v1727_v7, %s1933_s23 }
  0xdc   : > { %v1729_v9 = vpop.eup %1728 }
  0xdd   : > { %v238_v10 = vadd.f32 1.0, %v1729_v9 }
  0xdf   : > { %1730 = vrcp.f32 %v238_v10 }
  0xe9   : > { %v1731_v11 = vpop.eup %1730 }
  0xea   : > { %v242_v14 = vmul.f32 0.0, %v1731_v11 }
 0x14d   : > { %v245_v12 = vpop.permute.xlu0 %244 }
 0x14e   : > { %v247_v13 = vmul.f32 %v1731_v11, %v245_v12 }
 0x150   : > { %249 = vrot.lane.b32.xlu1 %v247_v13, %s1934_s24 }
 0x1c2   : > { %v250_v15 = vpop.permute.xlu1 %249 }
 0x1c3   : > { %v2054_v16 = vadd.f32 %v250_v15, %v242_v14 }
 0x1c5   : > { %1732 = vtanh.f32 %v2054_v16  ;;  %v377_v3 = vrot.slane %v2054_v16, 7 }
 0x1cf   : > { %v1733_v40 = vpop.eup %1732 }
 0x1d0   : > { %255 = vrot.lane.b32.xlu1 %v1733_v40, %s1933_s23 }
 0x242   : > { %v256_v43 = vpop.permute.xlu1 %255 }
 0x243   : > { %v258_v44 = vmul.f32 %v1731_v11, %v256_v43 }
 0x245   : > { %260 = vrot.lane.b32.xlu0 %v258_v44, %s1934_s24 }
 0x2b7   : > { %v261_v45 = vpop.permute.xlu0 %260 }
 0x2b8   : > { %v264_v46 = vsel %vm263_vm0, %v261_v45, 0.0 }
 0x2b9   : > { %1510 = vmatmul.mubr.msk.f32.vlgmr.msra.gmra.mrb[0].mxu0 %vm265_vm1, %v264_v46 }
 0x2ba   : > { %1587 = vmatpush1.bf16.msra.mxu0 %v2059_v24  ;;  %615 = vmatprep.mubr.f32.mxu0 %v1935_v42 }
 0x2bb   : > { %1589 = vmatprep.subr.bf16.mxu0 %v2061_v25 }
 0x2be   : > { %1591 = vmatpush1.bf16.msra.mxu0 %v2066_v30 }
 0x2bf   : > { %1593 = vmatprep.subr.bf16.mxu0 %v2070_v31 }
 0x2c2   : > { %1595 = vmatpush1.bf16.msra.mxu0 %v2074_v36 }
 0x2c3   : > { %1597 = vmatprep.subr.bf16.mxu0 %v2078_v37 }
 0x2c6   : > { %1599 = vmatpush1.bf16.msra.mxu0 %v2083_v41 }
 0x2c7   : > { %1617 = vmatprep.subr.bf16.mxu0 %v2057_v20 }
 0x38c   : > { %v335_v48 = vpop.f32.mrb[0].mxu0 }
 0x38d   : > { %v366_v49 = vrot.slane %v335_v48, 7  ;;  %v337_v50 = vpop.f32.mrb[1].mxu0 }
 0x38e   : > { %v340_v51 = vadd.f32 %v337_v50, %v2106_v47 }
 0x38f   : > { %v368_v52 = vadd.f32 %v366_v49, %v2048_v6 }
 0x390   : > { %1734 = vtanh.f32 %v340_v51  ;;  %v1511_v55 = vmul.f32 -1.442695, %v340_v51 }
 0x391   : > { %1736 = vtanh.f32 %v368_v52  ;;  %v1512_v56 = vmul.f32 -1.442695, %v368_v52 }
 0x392   : > { %1738 = vpow2.f32 %v1511_v55 }
 0x393   : > { %1740 = vpow2.f32 %v1512_v56 }
 0x39a   : > { %v1735_v53 = vpop.eup %1734 }
 0x39b   : > { %v1737_v54 = vpop.eup %1736  ;;  %350 = vrot.lane.b32.xlu1 %v1735_v53, %s1933_s23 }
 0x39c   : > { %381 = vrot.lane.b32.xlu0 %v1737_v54, %s1933_s23  ;;  %v1739_v57 = vpop.eup %1738 }
 0x39d   : > { %v1741_v58 = vpop.eup %1740  ;;  %v344_v59 = vadd.f32 1.0, %v1739_v57 }
 0x39e   : > { %v372_v60 = vadd.f32 1.0, %v1741_v58 }
 0x39f   : > { %1742 = vrcp.f32 %v344_v59 }
 0x3a0   : > { %1744 = vrcp.f32 %v372_v60 }
 0x3a9   : > { %v1743_v61 = vpop.eup %1742 }
 0x3aa   : > { %v1745_v63 = vpop.eup %1744  ;;  %v348_v4 = vmul.f32 0.0, %v1743_v61 }
 0x3ab   : > { %v379_v7 = vmul.f32 %v1745_v63, %v377_v3 }
 0x40d   : > { %v351_v62 = vpop.permute.xlu1 %350 }
 0x40e   : > { %v353_v0 = vmul.f32 %v1743_v61, %v351_v62  ;;  %v382_v1 = vpop.permute.xlu0 %381 }
 0x40f   : > { %v384_v2 = vmul.f32 %v1745_v63, %v382_v1 }
 0x410   : > { %355 = vrot.lane.b32.xlu1 %v353_v0, %s1934_s24 }
 0x411   : > { %386 = vrot.lane.b32.xlu0 %v384_v2, %s1934_s24 }
 0x482   : > { %v356_v5 = vpop.permute.xlu1 %355 }
 0x483   : > { %v358_v8 = vadd.f32 %v356_v5, %v348_v4  ;;  %v387_v9 = vpop.permute.xlu0 %386 }
 0x484   : > { %v389_v10 = vadd.f32 %v387_v9, %v379_v7 }
 0x485   : > { %1746 = vtanh.f32 %v358_v8 }
 0x486   : > { %1748 = vtanh.f32 %v389_v10  ;;  %v518_v51 = vrot.slane %v389_v10, 7 }
 0x48f   : > { %v1747_v11 = vpop.eup %1746 }
 0x490   : > { %v1749_v12 = vpop.eup %1748  ;;  %361 = vrot.lane.b32.xlu1 %v1747_v11, %s1933_s23 }
 0x491   : > { %392 = vrot.lane.b32.xlu0 %v1749_v12, %s1933_s23 }
 0x502   : > { %v362_v13 = vpop.permute.xlu1 %361 }
 0x503   : > { %v364_v14 = vmul.f32 %v1743_v61, %v362_v13  ;;  %v393_v15 = vpop.permute.xlu0 %392 }
 0x504   : > { %v395_v17 = vmul.f32 %v1745_v63, %v393_v15 }
 0x505   : > { %v401_v18 = vrot.slane %v364_v14, 7 }
 0x506   : > { %397 = vrot.lane.b32.xlu1 %v395_v17, %s1934_s24 }
 0x507   : > { %402 = vrot.lane.b32.xlu0 %v401_v18, %s1933_s23 }
 0x578   : > { %v398_v16 = vpop.permute.xlu1 %397 }
 0x579   : > { %v403_v19 = vpop.permute.xlu0 %402 }
 0x57a   : > { %v405_v21 = vsel %vm263_vm0, %v398_v16, %v403_v19 }
 0x57b   : > { %v407_v22 = vrot.slane %v405_v21, 1 }
 0x57d   : > { %1513 = vmatmul.mubr.msk.f32.vlgmr.msra.gmra.mrb[0].mxu1 %vm265_vm1, %v407_v22 }
 0x57e   : > { %1603 = vmatpush1.bf16.msra.mxu1 %v2059_v24  ;;  %756 = vmatprep.mubr.f32.mxu1 %v1935_v42 }
 0x57f   : > { %1605 = vmatprep.subr.bf16.mxu1 %v2061_v25 }
 0x582   : > { %1607 = vmatpush1.bf16.msra.mxu1 %v2066_v30 }
 0x583   : > { %1609 = vmatprep.subr.bf16.mxu1 %v2070_v31 }
 0x586   : > { %1611 = vmatpush1.bf16.msra.mxu1 %v2074_v36 }
 0x587   : > { %1613 = vmatprep.subr.bf16.mxu1 %v2078_v37 }
 0x58a   : > { %1615 = vmatpush1.bf16.msra.mxu1 %v2083_v41 }
 0x58b   : > { %1633 = vmatprep.subr.bf16.mxu1 %v2057_v20 }
 0x650   : > { %v476_v23 = vpop.f32.mrb[0].mxu1 }
 0x651   : > { %v507_v26 = vrot.slane %v476_v23, 6  ;;  %v478_v27 = vpop.f32.mrb[1].mxu1 }
 0x652   : > { %v481_v28 = vadd.f32 %v478_v27, %v2106_v47 }
 0x653   : > { %v509_v29 = vadd.f32 %v507_v26, %v2048_v6 }
 0x654   : > { %1750 = vtanh.f32 %v481_v28  ;;  %v1514_v34 = vmul.f32 -1.442695, %v481_v28 }
 0x655   : > { %1752 = vtanh.f32 %v509_v29  ;;  %v1515_v35 = vmul.f32 -1.442695, %v509_v29 }
 0x656   : > { %1754 = vpow2.f32 %v1514_v34 }
 0x657   : > { %1756 = vpow2.f32 %v1515_v35 }
 0x65e   : > { %v1751_v32 = vpop.eup %1750 }
 0x65f   : > { %v1753_v33 = vpop.eup %1752  ;;  %491 = vrot.lane.b32.xlu1 %v1751_v32, %s1933_s23 }
 0x660   : > { %522 = vrot.lane.b32.xlu0 %v1753_v33, %s1933_s23  ;;  %v1755_v38 = vpop.eup %1754 }
 0x661   : > { %v1757_v39 = vpop.eup %1756  ;;  %v485_v40 = vadd.f32 1.0, %v1755_v38 }
 0x662   : > { %v513_v43 = vadd.f32 1.0, %v1757_v39 }
 0x663   : > { %1758 = vrcp.f32 %v485_v40 }
 0x664   : > { %1760 = vrcp.f32 %v513_v43 }
 0x66d   : > { %v1759_v44 = vpop.eup %1758 }
 0x66e   : > { %v1761_v46 = vpop.eup %1760  ;;  %v489_v52 = vmul.f32 %v1759_v44, %v358_v8 }
 0x66f   : > { %v520_v54 = vmul.f32 %v1761_v46, %v518_v51 }
 0x6d1   : > { %v492_v45 = vpop.permute.xlu1 %491 }
 0x6d2   : > { %v494_v48 = vmul.f32 %v1759_v44, %v492_v45  ;;  %v523_v49 = vpop.permute.xlu0 %522 }
 0x6d3   : > { %v525_v50 = vmul.f32 %v1761_v46, %v523_v49 }
 0x6d4   : > { %496 = vrot.lane.b32.xlu1 %v494_v48, %s1934_s24 }
 0x6d5   : > { %527 = vrot.lane.b32.xlu0 %v525_v50, %s1934_s24 }
 0x746   : > { %v497_v53 = vpop.permute.xlu1 %496 }
 0x747   : > { %v499_v55 = vadd.f32 %v497_v53, %v489_v52  ;;  %v528_v56 = vpop.permute.xlu0 %527 }
 0x748   : > { %v530_v57 = vadd.f32 %v528_v56, %v520_v54 }
 0x749   : > { %1762 = vtanh.f32 %v499_v55 }
 0x74a   : > { %1764 = vtanh.f32 %v530_v57  ;;  %v659_v28 = vrot.slane %v530_v57, 7 }
 0x753   : > { %v1763_v58 = vpop.eup %1762 }
 0x754   : > { %v1765_v59 = vpop.eup %1764  ;;  %502 = vrot.lane.b32.xlu1 %v1763_v58, %s1933_s23 }
 0x755   : > { %533 = vrot.lane.b32.xlu0 %v1765_v59, %s1933_s23 }
 0x7c6   : > { %v503_v60 = vpop.permute.xlu1 %502 }
 0x7c7   : > { %v505_v61 = vmul.f32 %v1759_v44, %v503_v60  ;;  %v534_v62 = vpop.permute.xlu0 %533 }
 0x7c8   : > { %v536_v63 = vmul.f32 %v1761_v46, %v534_v62 }
 0x7c9   : > { %v542_v0 = vrot.slane %v505_v61, 6 }
 0x7ca   : > { %538 = vrot.lane.b32.xlu1 %v536_v63, %s1934_s24 }
 0x7cb   : > { %543 = vrot.lane.b32.xlu0 %v542_v0, %s1933_s23 }
 0x83c   : > { %v539_v1 = vpop.permute.xlu1 %538 }
 0x83d   : > { %v544_v2 = vpop.permute.xlu0 %543 }
 0x83e   : > { %v546_v3 = vsel %vm263_vm0, %v539_v1, %v544_v2 }
 0x83f   : > { %v548_v4 = vrot.slane %v546_v3, 2 }
 0x841   : > { %1516 = vmatmul.mubr.msk.f32.vlgmr.msra.gmra.mrb[2].mxu0 %vm265_vm1, %v548_v4 }
 0x842   : > { %1619 = vmatpush1.bf16.msra.mxu0 %v2059_v24  ;;  %897 = vmatprep.mubr.f32.mxu0 %v1935_v42 }
 0x843   : > { %1621 = vmatprep.subr.bf16.mxu0 %v2061_v25 }
 0x846   : > { %1623 = vmatpush1.bf16.msra.mxu0 %v2066_v30 }
 0x847   : > { %1625 = vmatprep.subr.bf16.mxu0 %v2070_v31 }
 0x84a   : > { %1627 = vmatpush1.bf16.msra.mxu0 %v2074_v36 }
 0x84b   : > { %1629 = vmatprep.subr.bf16.mxu0 %v2078_v37 }
 0x84e   : > { %1631 = vmatpush1.bf16.msra.mxu0 %v2083_v41 }
 0x84f   : > { %1649 = vmatprep.subr.bf16.mxu0 %v2057_v20 }
 0x914   : > { %v617_v5 = vpop.f32.mrb[2].mxu0 }
 0x915   : > { %v648_v7 = vrot.slane %v617_v5, 5  ;;  %v619_v8 = vpop.f32.mrb[3].mxu0 }
 0x916   : > { %v622_v9 = vadd.f32 %v619_v8, %v2106_v47 }
 0x917   : > { %v650_v10 = vadd.f32 %v648_v7, %v2048_v6 }
 0x918   : > { %1766 = vtanh.f32 %v622_v9  ;;  %v1517_v13 = vmul.f32 -1.442695, %v622_v9 }
 0x919   : > { %1768 = vtanh.f32 %v650_v10  ;;  %v1518_v14 = vmul.f32 -1.442695, %v650_v10 }
 0x91a   : > { %1770 = vpow2.f32 %v1517_v13 }
 0x91b   : > { %1772 = vpow2.f32 %v1518_v14 }
 0x922   : > { %v1767_v11 = vpop.eup %1766 }
 0x923   : > { %v1769_v12 = vpop.eup %1768  ;;  %632 = vrot.lane.b32.xlu1 %v1767_v11, %s1933_s23 }
 0x924   : > { %663 = vrot.lane.b32.xlu0 %v1769_v12, %s1933_s23  ;;  %v1771_v15 = vpop.eup %1770 }
 0x925   : > { %v1773_v17 = vpop.eup %1772  ;;  %v626_v18 = vadd.f32 1.0, %v1771_v15 }
 0x926   : > { %v654_v16 = vadd.f32 1.0, %v1773_v17 }
 0x927   : > { %1774 = vrcp.f32 %v626_v18 }
 0x928   : > { %1776 = vrcp.f32 %v654_v16 }
 0x931   : > { %v1775_v19 = vpop.eup %1774 }
 0x932   : > { %v1777_v22 = vpop.eup %1776  ;;  %v630_v29 = vmul.f32 %v1775_v19, %v499_v55 }
 0x933   : > { %v661_v33 = vmul.f32 %v1777_v22, %v659_v28 }
 0x995   : > { %v633_v21 = vpop.permute.xlu1 %632 }
 0x996   : > { %v635_v23 = vmul.f32 %v1775_v19, %v633_v21  ;;  %v664_v26 = vpop.permute.xlu0 %663 }
 0x997   : > { %v666_v27 = vmul.f32 %v1777_v22, %v664_v26 }
 0x998   : > { %637 = vrot.lane.b32.xlu1 %v635_v23, %s1934_s24 }
 0x999   : > { %668 = vrot.lane.b32.xlu0 %v666_v27, %s1934_s24 }
 0xa0a   : > { %v638_v32 = vpop.permute.xlu1 %637 }
 0xa0b   : > { %v640_v34 = vadd.f32 %v638_v32, %v630_v29  ;;  %v669_v35 = vpop.permute.xlu0 %668 }
 0xa0c   : > { %v671_v38 = vadd.f32 %v669_v35, %v661_v33 }
 0xa0d   : > { %1778 = vtanh.f32 %v640_v34 }
 0xa0e   : > { %1780 = vtanh.f32 %v671_v38  ;;  %v800_v8 = vrot.slane %v671_v38, 7 }
 0xa17   : > { %v1779_v39 = vpop.eup %1778 }
 0xa18   : > { %v1781_v40 = vpop.eup %1780  ;;  %643 = vrot.lane.b32.xlu1 %v1779_v39, %s1933_s23 }
 0xa19   : > { %674 = vrot.lane.b32.xlu0 %v1781_v40, %s1933_s23 }
 0xa8a   : > { %v644_v43 = vpop.permute.xlu1 %643 }
 0xa8b   : > { %v646_v44 = vmul.f32 %v1775_v19, %v644_v43  ;;  %v675_v45 = vpop.permute.xlu0 %674 }
 0xa8c   : > { %v677_v46 = vmul.f32 %v1777_v22, %v675_v45 }
 0xa8d   : > { %v683_v48 = vrot.slane %v646_v44, 5 }
 0xa8e   : > { %679 = vrot.lane.b32.xlu1 %v677_v46, %s1934_s24 }
 0xa8f   : > { %684 = vrot.lane.b32.xlu0 %v683_v48, %s1933_s23 }
 0xb00   : > { %v680_v49 = vpop.permute.xlu1 %679 }
 0xb01   : > { %v685_v50 = vpop.permute.xlu0 %684 }
 0xb02   : > { %v687_v51 = vsel %vm263_vm0, %v680_v49, %v685_v50 }
 0xb03   : > { %v689_v52 = vrot.slane %v687_v51, 3 }
 0xb05   : > { %1519 = vmatmul.mubr.msk.f32.vlgmr.msra.gmra.mrb[2].mxu1 %vm265_vm1, %v689_v52 }
 0xb06   : > { %1635 = vmatpush1.bf16.msra.mxu1 %v2059_v24  ;;  %1038 = vmatprep.mubr.f32.mxu1 %v1935_v42 }
 0xb07   : > { %1637 = vmatprep.subr.bf16.mxu1 %v2061_v25 }
 0xb0a   : > { %1639 = vmatpush1.bf16.msra.mxu1 %v2066_v30 }
 0xb0b   : > { %1641 = vmatprep.subr.bf16.mxu1 %v2070_v31 }
 0xb0e   : > { %1643 = vmatpush1.bf16.msra.mxu1 %v2074_v36 }
 0xb0f   : > { %1645 = vmatprep.subr.bf16.mxu1 %v2078_v37 }
 0xb12   : > { %1647 = vmatpush1.bf16.msra.mxu1 %v2083_v41 }
 0xb13   : > { %1665 = vmatprep.subr.bf16.mxu1 %v2057_v20 }
 0xbd8   : > { %v758_v53 = vpop.f32.mrb[2].mxu1 }
 0xbd9   : > { %v789_v54 = vrot.slane %v758_v53, 4  ;;  %v760_v55 = vpop.f32.mrb[3].mxu1 }
 0xbda   : > { %v763_v56 = vadd.f32 %v760_v55, %v2106_v47 }
 0xbdb   : > { %v791_v57 = vadd.f32 %v789_v54, %v2048_v6 }
 0xbdc   : > { %1782 = vtanh.f32 %v763_v56  ;;  %v1520_v60 = vmul.f32 -1.442695, %v763_v56 }
 0xbdd   : > { %1784 = vtanh.f32 %v791_v57  ;;  %v1521_v61 = vmul.f32 -1.442695, %v791_v57 }
 0xbde   : > { %1786 = vpow2.f32 %v1520_v60 }
 0xbdf   : > { %1788 = vpow2.f32 %v1521_v61 }
 0xbe6   : > { %v1783_v58 = vpop.eup %1782 }
 0xbe7   : > { %v1785_v59 = vpop.eup %1784  ;;  %773 = vrot.lane.b32.xlu1 %v1783_v58, %s1933_s23 }
 0xbe8   : > { %804 = vrot.lane.b32.xlu0 %v1785_v59, %s1933_s23  ;;  %v1787_v20 = vpop.eup %1786 }
 0xbe9   : > { %v1789_v62 = vpop.eup %1788  ;;  %v767_v63 = vadd.f32 1.0, %v1787_v20 }
 0xbea   : > { %v795_v0 = vadd.f32 1.0, %v1789_v62 }
 0xbeb   : > { %1790 = vrcp.f32 %v767_v63 }
 0xbec   : > { %1792 = vrcp.f32 %v795_v0 }
 0xbf5   : > { %v1791_v1 = vpop.eup %1790 }
 0xbf6   : > { %v1793_v3 = vpop.eup %1792  ;;  %v771_v9 = vmul.f32 %v1791_v1, %v640_v34 }
 0xbf7   : > { %v802_v11 = vmul.f32 %v1793_v3, %v800_v8 }
 0xc59   : > { %v774_v2 = vpop.permute.xlu1 %773 }
 0xc5a   : > { %v776_v4 = vmul.f32 %v1791_v1, %v774_v2  ;;  %v805_v5 = vpop.permute.xlu0 %804 }
 0xc5b   : > { %v807_v7 = vmul.f32 %v1793_v3, %v805_v5 }
 0xc5c   : > { %778 = vrot.lane.b32.xlu1 %v776_v4, %s1934_s24 }
 0xc5d   : > { %809 = vrot.lane.b32.xlu0 %v807_v7, %s1934_s24 }
 0xcce   : > { %v779_v10 = vpop.permute.xlu1 %778 }
 0xccf   : > { %v781_v12 = vadd.f32 %v779_v10, %v771_v9  ;;  %v810_v13 = vpop.permute.xlu0 %809 }
 0xcd0   : > { %v812_v14 = vadd.f32 %v810_v13, %v802_v11 }
 0xcd1   : > { %1794 = vtanh.f32 %v781_v12 }
 0xcd2   : > { %1796 = vtanh.f32 %v812_v14  ;;  %v941_v55 = vrot.slane %v812_v14, 7 }
 0xcdb   : > { %v1795_v15 = vpop.eup %1794 }
 0xcdc   : > { %v1797_v17 = vpop.eup %1796  ;;  %784 = vrot.lane.b32.xlu1 %v1795_v15, %s1933_s23 }
 0xcdd   : > { %815 = vrot.lane.b32.xlu0 %v1797_v17, %s1933_s23 }
 0xd4e   : > { %v785_v18 = vpop.permute.xlu1 %784 }
 0xd4f   : > { %v787_v16 = vmul.f32 %v1791_v1, %v785_v18  ;;  %v816_v19 = vpop.permute.xlu0 %815 }
 0xd50   : > { %v818_v21 = vmul.f32 %v1793_v3, %v816_v19 }
 0xd51   : > { %v824_v22 = vrot.slane %v787_v16, 4 }
 0xd52   : > { %820 = vrot.lane.b32.xlu1 %v818_v21, %s1934_s24 }
 0xd53   : > { %825 = vrot.lane.b32.xlu0 %v824_v22, %s1933_s23 }
 0xdc4   : > { %v821_v23 = vpop.permute.xlu1 %820 }
 0xdc5   : > { %v826_v26 = vpop.permute.xlu0 %825 }
 0xdc6   : > { %v828_v27 = vsel %vm263_vm0, %v821_v23, %v826_v26 }
 0xdc7   : > { %v830_v28 = vrot.slane %v828_v27, 4 }
 0xdc9   : > { %1522 = vmatmul.mubr.msk.f32.vlgmr.msra.gmra.mrb[4].mxu0 %vm265_vm1, %v830_v28 }
 0xdca   : > { %1651 = vmatpush1.bf16.msra.mxu0 %v2059_v24  ;;  %1179 = vmatprep.mubr.f32.mxu0 %v1935_v42 }
 0xdcb   : > { %1653 = vmatprep.subr.bf16.mxu0 %v2061_v25 }
 0xdce   : > { %1655 = vmatpush1.bf16.msra.mxu0 %v2066_v30 }
 0xdcf   : > { %1657 = vmatprep.subr.bf16.mxu0 %v2070_v31 }
 0xdd2   : > { %1659 = vmatpush1.bf16.msra.mxu0 %v2074_v36 }
 0xdd3   : > { %1661 = vmatprep.subr.bf16.mxu0 %v2078_v37 }
 0xdd6   : > { %1663 = vmatpush1.bf16.msra.mxu0 %v2083_v41 }
 0xe9c   : > { %v899_v29 = vpop.f32.mrb[4].mxu0 }
 0xe9d   : > { %v930_v32 = vrot.slane %v899_v29, 3  ;;  %v901_v33 = vpop.f32.mrb[5].mxu0 }
 0xe9e   : > { %v904_v34 = vadd.f32 %v901_v33, %v2106_v47 }
 0xe9f   : > { %v932_v35 = vadd.f32 %v930_v32, %v2048_v6 }
 0xea0   : > { %1798 = vtanh.f32 %v904_v34  ;;  %v1523_v40 = vmul.f32 -1.442695, %v904_v34 }
 0xea1   : > { %1800 = vtanh.f32 %v932_v35  ;;  %v1524_v43 = vmul.f32 -1.442695, %v932_v35 }
 0xea2   : > { %1802 = vpow2.f32 %v1523_v40 }
 0xea3   : > { %1804 = vpow2.f32 %v1524_v43 }
 0xeaa   : > { %v1799_v38 = vpop.eup %1798 }
 0xeab   : > { %v1801_v39 = vpop.eup %1800  ;;  %914 = vrot.lane.b32.xlu1 %v1799_v38, %s1933_s23 }
 0xeac   : > { %945 = vrot.lane.b32.xlu0 %v1801_v39, %s1933_s23  ;;  %v1803_v44 = vpop.eup %1802 }
 0xead   : > { %v1805_v45 = vpop.eup %1804  ;;  %v908_v46 = vadd.f32 1.0, %v1803_v44 }
 0xeae   : > { %v936_v48 = vadd.f32 1.0, %v1805_v45 }
 0xeaf   : > { %1806 = vrcp.f32 %v908_v46 }
 0xeb0   : > { %1808 = vrcp.f32 %v936_v48 }
 0xeb9   : > { %v1807_v49 = vpop.eup %1806 }
 0xeba   : > { %v1809_v51 = vpop.eup %1808  ;;  %v912_v56 = vmul.f32 %v1807_v49, %v781_v12 }
 0xebb   : > { %v943_v58 = vmul.f32 %v1809_v51, %v941_v55 }
 0xf1d   : > { %v915_v50 = vpop.permute.xlu1 %914 }
 0xf1e   : > { %v917_v52 = vmul.f32 %v1807_v49, %v915_v50  ;;  %v946_v53 = vpop.permute.xlu0 %945 }
 0xf1f   : > { %v948_v54 = vmul.f32 %v1809_v51, %v946_v53 }
 0xf20   : > { %919 = vrot.lane.b32.xlu1 %v917_v52, %s1934_s24 }
 0xf21   : > { %950 = vrot.lane.b32.xlu0 %v948_v54, %s1934_s24 }
 0xf92   : > { %v920_v57 = vpop.permute.xlu1 %919 }
 0xf93   : > { %v922_v59 = vadd.f32 %v920_v57, %v912_v56  ;;  %v951_v60 = vpop.permute.xlu0 %950 }
 0xf94   : > { %v953_v61 = vadd.f32 %v951_v60, %v943_v58 }
 0xf95   : > { %1810 = vtanh.f32 %v922_v59 }
 0xf96   : > { %1812 = vtanh.f32 %v953_v61  ;;  %v1082_v22 = vrot.slane %v953_v61, 7 }
 0xf9f   : > { %v1811_v20 = vpop.eup %1810 }
 0xfa0   : > { %v1813_v62 = vpop.eup %1812  ;;  %925 = vrot.lane.b32.xlu1 %v1811_v20, %s1933_s23 }
 0xfa1   : > { %956 = vrot.lane.b32.xlu0 %v1813_v62, %s1933_s23 }
0x1012   : > { %v926_v63 = vpop.permute.xlu1 %925 }
0x1013   : > { %v928_v0 = vmul.f32 %v1807_v49, %v926_v63  ;;  %v957_v1 = vpop.permute.xlu0 %956 }
0x1014   : > { %v959_v2 = vmul.f32 %v1809_v51, %v957_v1 }
0x1015   : > { %v965_v3 = vrot.slane %v928_v0, 3 }
0x1016   : > { %961 = vrot.lane.b32.xlu1 %v959_v2, %s1934_s24 }
0x1017   : > { %966 = vrot.lane.b32.xlu0 %v965_v3, %s1933_s23 }
0x1088   : > { %v962_v4 = vpop.permute.xlu1 %961 }
0x1089   : > { %v967_v5 = vpop.permute.xlu0 %966 }
0x108a   : > { %v969_v7 = vsel %vm263_vm0, %v962_v4, %v967_v5 }
0x108b   : > { %v971_v8 = vrot.slane %v969_v7, 5 }
0x108d   : > { %1525 = vmatmul.mubr.msk.f32.vlgmr.msra.gmra.mrb[4].mxu1 %vm265_vm1, %v971_v8 }
0x108e   : > { %1667 = vmatpush1.bf16.msra.mxu1 %v2059_v24  ;;  %1320 = vmatprep.mubr.f32.mxu1 %v1935_v42 }
0x108f   : > { %1669 = vmatprep.subr.bf16.mxu1 %v2061_v25 }
0x1092   : > { %1671 = vmatpush1.bf16.msra.mxu1 %v2066_v30 }
0x1093   : > { %1673 = vmatprep.subr.bf16.mxu1 %v2070_v31 }
0x1096   : > { %1675 = vmatpush1.bf16.msra.mxu1 %v2074_v36 }
0x1097   : > { %1677 = vmatprep.subr.bf16.mxu1 %v2078_v37 }
0x109a   : > { %1679 = vmatpush1.bf16.msra.mxu1 %v2083_v41 }
0x1160   : > { %v1040_v9 = vpop.f32.mrb[4].mxu1 }
0x1161   : > { %v1071_v10 = vrot.slane %v1040_v9, 2  ;;  %v1042_v11 = vpop.f32.mrb[5].mxu1 }
0x1162   : > { %v1045_v12 = vadd.f32 %v1042_v11, %v2106_v47 }
0x1163   : > { %v1073_v24 = vadd.f32 %v1071_v10, %v2048_v6 }
0x1164   : > { %1814 = vtanh.f32 %v1045_v12  ;;  %v1526_v30 = vmul.f32 -1.442695, %v1045_v12 }
0x1165   : > { %1816 = vtanh.f32 %v1073_v24  ;;  %v1527_v31 = vmul.f32 -1.442695, %v1073_v24 }
0x1166   : > { %1818 = vpow2.f32 %v1526_v30 }
0x1167   : > { %1820 = vpow2.f32 %v1527_v31 }
0x116e   : > { %v1815_v25 = vpop.eup %1814 }
0x116f   : > { %v1817_v13 = vpop.eup %1816  ;;  %1055 = vrot.lane.b32.xlu1 %v1815_v25, %s1933_s23 }
0x1170   : > { %1086 = vrot.lane.b32.xlu0 %v1817_v13, %s1933_s23  ;;  %v1819_v36 = vpop.eup %1818 }
0x1171   : > { %v1821_v37 = vpop.eup %1820  ;;  %v1049_v41 = vadd.f32 1.0, %v1819_v36 }
0x1172   : > { %v1077_v14 = vadd.f32 1.0, %v1821_v37 }
0x1173   : > { %1822 = vrcp.f32 %v1049_v41 }
0x1174   : > { %1824 = vrcp.f32 %v1077_v14 }
0x117d   : > { %v1823_v15 = vpop.eup %1822 }
0x117e   : > { %v1825_v18 = vpop.eup %1824  ;;  %v1053_v23 = vmul.f32 %v1823_v15, %v922_v59 }
0x117f   : > { %v1084_v27 = vmul.f32 %v1825_v18, %v1082_v22 }
0x11e1   : > { %v1056_v17 = vpop.permute.xlu1 %1055 }
0x11e2   : > { %v1058_v16 = vmul.f32 %v1823_v15, %v1056_v17  ;;  %v1087_v19 = vpop.permute.xlu0 %1086 }
0x11e3   : > { %v1089_v21 = vmul.f32 %v1825_v18, %v1087_v19 }
0x11e4   : > { %1060 = vrot.lane.b32.xlu1 %v1058_v16, %s1934_s24 }
0x11e5   : > { %1091 = vrot.lane.b32.xlu0 %v1089_v21, %s1934_s24 }
0x1256   : > { %v1061_v26 = vpop.permute.xlu1 %1060 }
0x1257   : > { %v1063_v28 = vadd.f32 %v1061_v26, %v1053_v23  ;;  %v1092_v29 = vpop.permute.xlu0 %1091 }
0x1258   : > { %v1094_v32 = vadd.f32 %v1092_v29, %v1084_v27 }
0x1259   : > { %1826 = vtanh.f32 %v1063_v28 }
0x125a   : > { %1828 = vtanh.f32 %v1094_v32  ;;  %v1223_v2 = vrot.slane %v1094_v32, 7  ;;  %v194_v32 = vld [vmem:[#allocation4] sm:$0xff] }
0x1263   : > { %v1827_v33 = vpop.eup %1826 }
0x1264   : > { %v1829_v34 = vpop.eup %1828  ;;  %1066 = vrot.lane.b32.xlu1 %v1827_v33, %s1933_s23  ;;  %v196_v33 = vld [vmem:[#allocation4 + $0x10] sm:$0xff] }
0x1265   : > { %1097 = vrot.lane.b32.xlu0 %v1829_v34, %s1933_s23  ;;  %v1936_v34 = vmov 0.0|0.0  }
0x1266   : > { %1680 = vmatprep.subr.bf16.mxu0 %v1936_v34 }
0x12d6   : > { %v1067_v35 = vpop.permute.xlu1 %1066 }
0x12d7   : > { %v1069_v38 = vmul.f32 %v1823_v15, %v1067_v35  ;;  %v1098_v39 = vpop.permute.xlu0 %1097 }
0x12d8   : > { %v1100_v40 = vmul.f32 %v1825_v18, %v1098_v39 }
0x12d9   : > { %v1106_v43 = vrot.slane %v1069_v38, 2  ;;  %v197_v38 = vld [vmem:[#allocation4 + $0x18] sm:$0xff] }
0x12da   : > { %1102 = vrot.lane.b32.xlu1 %v1100_v40, %s1934_s24  ;;  %v1684_v39 = vpack.c.bf16 %v197_v38, %v196_v33 }
0x12db   : > { %1107 = vrot.lane.b32.xlu0 %v1106_v43, %s1933_s23 }
0x134c   : > { %v1103_v44 = vpop.permute.xlu1 %1102 }
0x134d   : > { %v1108_v45 = vpop.permute.xlu0 %1107 }
0x134e   : > { %v1110_v46 = vsel %vm263_vm0, %v1103_v44, %v1108_v45 }
0x134f   : > { %v1112_v48 = vrot.slane %v1110_v46, 6  ;;  %v201_v46 = vld [vmem:[#allocation4 + $0x23] sm:$0x1] }
0x1351   : > { %1528 = vmatmul.mubr.msk.f32.vlgmr.msra.gmra.mrb[6].mxu0 %vm265_vm1, %v1112_v48 }
0x1352   : > { %1549 = vmatprep.mubr.msk.f32.mxu0 %vm1937_vm2, %v1935_v42 }
0x1424   : > { %v1181_v49 = vpop.f32.mrb[6].mxu0 }
0x1425   : > { %v1212_v50 = vrot.slane %v1181_v49, 1  ;;  %v1183_v51 = vpop.f32.mrb[7].mxu0 }
0x1426   : > { %v1186_v52 = vadd.f32 %v1183_v51, %v2106_v47 }
0x1427   : > { %v1214_v53 = vadd.f32 %v1212_v50, %v2048_v6 }
0x1428   : > { %1830 = vtanh.f32 %v1186_v52  ;;  %v1529_v56 = vmul.f32 -1.442695, %v1186_v52 }
0x1429   : > { %1832 = vtanh.f32 %v1214_v53  ;;  %v1530_v57 = vmul.f32 -1.442695, %v1214_v53 }
0x142a   : > { %1834 = vpow2.f32 %v1529_v56 }
0x142b   : > { %1836 = vpow2.f32 %v1530_v57 }
0x1432   : > { %v1831_v54 = vpop.eup %1830 }
0x1433   : > { %v1833_v55 = vpop.eup %1832  ;;  %1196 = vrot.lane.b32.xlu1 %v1831_v54, %s1933_s23 }
0x1434   : > { %1227 = vrot.lane.b32.xlu0 %v1833_v55, %s1933_s23  ;;  %v1835_v58 = vpop.eup %1834 }
0x1435   : > { %v1837_v59 = vpop.eup %1836  ;;  %v1190_v60 = vadd.f32 1.0, %v1835_v58 }
0x1436   : > { %v1218_v61 = vadd.f32 1.0, %v1837_v59 }
0x1437   : > { %1838 = vrcp.f32 %v1190_v60 }
0x1438   : > { %1840 = vrcp.f32 %v1218_v61 }
0x1441   : > { %v1839_v20 = vpop.eup %1838 }
0x1442   : > { %v1841_v62 = vpop.eup %1840  ;;  %v1194_v3 = vmul.f32 %v1839_v20, %v1063_v28 }
0x1443   : > { %v1225_v5 = vmul.f32 %v1841_v62, %v1223_v2 }
0x14a5   : > { %v1197_v6 = vpop.permute.xlu1 %1196 }
0x14a6   : > { %v1199_v63 = vmul.f32 %v1839_v20, %v1197_v6  ;;  %v1228_v0 = vpop.permute.xlu0 %1227 }
0x14a7   : > { %v1230_v1 = vmul.f32 %v1841_v62, %v1228_v0 }
0x14a8   : > { %1201 = vrot.lane.b32.xlu1 %v1199_v63, %s1934_s24 }
0x14a9   : > { %1232 = vrot.lane.b32.xlu0 %v1230_v1, %s1934_s24 }
0x151a   : > { %v1202_v4 = vpop.permute.xlu1 %1201 }
0x151b   : > { %v1204_v7 = vadd.f32 %v1202_v4, %v1194_v3  ;;  %v1233_v8 = vpop.permute.xlu0 %1232 }
0x151c   : > { %v1235_v9 = vadd.f32 %v1233_v8, %v1225_v5 }
0x151d   : > { %1842 = vtanh.f32 %v1204_v7 }
0x151e   : > { %1844 = vtanh.f32 %v1235_v9 }
0x1527   : > { %v1843_v10 = vpop.eup %1842 }
0x1528   : > { %v1845_v11 = vpop.eup %1844  ;;  %1207 = vrot.lane.b32.xlu1 %v1843_v10, %s1933_s23 }
0x1529   : > { %1238 = vrot.lane.b32.xlu0 %v1845_v11, %s1933_s23 }
0x159a   : > { %v1208_v12 = vpop.permute.xlu1 %1207 }
0x159b   : > { %v1210_v24 = vmul.f32 %v1839_v20, %v1208_v12  ;;  %v1239_v25 = vpop.permute.xlu0 %1238 }
0x159c   : > { %v1241_v13 = vmul.f32 %v1841_v62, %v1239_v25 }
0x159d   : > { %v1247_v30 = vrot.slane %v1210_v24, 1 }
0x159e   : > { %1243 = vrot.lane.b32.xlu1 %v1241_v13, %s1934_s24 }
0x159f   : > { %1248 = vrot.lane.b32.xlu0 %v1247_v30, %s1933_s23 }
0x1610   : > { %v1244_v31 = vpop.permute.xlu1 %1243 }
0x1611   : > { %v1249_v36 = vpop.permute.xlu0 %1248 }
0x1612   : > { %v1251_v37 = vsel %vm263_vm0, %v1244_v31, %v1249_v36 }
0x1613   : > { %v1253_v41 = vrot.slane %v1251_v37, 7 }
0x1615   : > { %1531 = vmatmul.mubr.msk.f32.vlgmr.msra.gmra.mrb[6].mxu1 %vm265_vm1, %v1253_v41 }
0x16e8   : > { %v1322_v14 = vpop.f32.mrb[6].mxu1 }
0x16e9   : > { %v1323_v15 = vpop.f32.mrb[7].mxu1 }
0x16ea   : > { %v1326_v17 = vadd.f32 %v1323_v15, %v2106_v47  ;;  %v195_v47 = vld [vmem:[#allocation4 + $0x8] sm:$0xff] }
0x16eb   : > { %v1681_v35 = vpack.c.bf16 %v195_v47, %v194_v32 }
0x16ec   : > { %1846 = vtanh.f32 %v1326_v17  ;;  %v1532_v16 = vmul.f32 -1.442695, %v1326_v17 }
0x16ed   : > { %1682 = vmatpush3.bf16.msra.mxu0 %v1681_v35 }
0x16ee   : > { %1848 = vpow2.f32 %v1532_v16  ;;  %1683 = vmatprep.subr.bf16.mxu0 %v1936_v34 }
0x16f1   : > { %1685 = vmatpush3.bf16.msra.mxu0 %v1684_v39 }
0x16f6   : > { %v1847_v18 = vpop.eup %1846 }
0x16f7   : > { %1336 = vrot.lane.b32.xlu1 %v1847_v18, %s1933_s23 }
0x16f8   : > { %v1849_v19 = vpop.eup %1848 }
0x16f9   : > { %v1330_v21 = vadd.f32 1.0, %v1849_v19 }
0x16fb   : > { %1850 = vrcp.f32 %v1330_v21 }
0x1705   : > { %v1851_v22 = vpop.eup %1850 }
0x1706   : > { %v1334_v27 = vmul.f32 %v1851_v22, %v1204_v7 }
0x1769   : > { %v1337_v23 = vpop.permute.xlu1 %1336 }
0x176a   : > { %v1339_v26 = vmul.f32 %v1851_v22, %v1337_v23 }
0x176c   : > { %1341 = vrot.lane.b32.xlu0 %v1339_v26, %s1934_s24 }
0x17de   : > { %v1342_v28 = vpop.permute.xlu0 %1341 }
0x17df   : > { %v1344_v29 = vadd.f32 %v1342_v28, %v1334_v27 }
0x17e1   : > { %1852 = vtanh.f32 %v1344_v29 }
0x17eb   : > { %v1853_v40 = vpop.eup %1852 }
0x17ec   : > { %1347 = vrot.lane.b32.xlu1 %v1853_v40, %s1933_s23 }
0x185e   : > { %v1348_v43 = vpop.permute.xlu1 %1347 }
0x185f   : > { %v1350_v44 = vmul.f32 %v1851_v22, %v1348_v43 }
0x1861   : > { %1352 = vrot.lane.b32.xlu0 %v1350_v44, %s1934_s24 }
0x18d3   : > { %v1353_v45 = vpop.permute.xlu0 %1352 }
0x18d4   : > { %1550 = vmatmul.mubr.msk.f32.vlgmr.msra.gmra.mrb[8].mxu0 %vm263_vm0, %v1353_v45 }
0x19a7   : > { %v1422_v42 = vpop.f32.mrb[8].mxu0 }
0x19a8   : > { %v1423_v48 = vadd.f32 %v1422_v42, %v201_v46  ;;  %v1551_v49 = vpop.f32.mrb[9].mxu0 }
0x19aa   : > { %1427 = vst.msk [vmem:[%s193_s27] sm:$0x1] %vm1426_vm3, %v1423_v48 }
0x19ab PF: > { %s15_s12 = sadd.s32 1, %s1924_s12  }
0x19ac   : > { %p12_p5 = scmp.ge.s32.totalorder %s15_s12, 4  }
0x19ae   :  { %14 = sbr.rel (!%p12_p5) target bundleno = 2 (0x2), region = 71 }
0x19b5   :  { %1445 = vsyncpa [#allocation3], 1 }
0x19b6   :  { %1447 = vsyncpa [#allocation3 + $0x1], 1 }
0x19b7   :  { %1448 = vsyncpa [#allocation5], 1 }

</bundles_post_ra>
